<compile_context>
chip_gen: v7x
topology: tpu7x:2x2x1
jax: 0.10.0
libtpu: 0.0.40
codegen_flags: <defaults>
</compile_context>

<pallas_src>
import functools

import jax
import jax.numpy as jnp
from jax.experimental import pallas as pl
from jax.experimental.pallas import tpu as pltpu


# ----------------------------------------------------------------------------
# Fused kernel: [conv3x3 + bias + BN(batch stats) + ReLU] x 2
# ----------------------------------------------------------------------------
def _twocon_kernel(x_ref, w1_ref, b1_ref, g1_ref, be1_ref,
                   w2_ref, b2_ref, g2_ref, be2_ref,
                   o_ref, xpad_ref, h1pad_ref, *, eps):
    # x_ref    : (N, H, W, Cin)       pooled input, full batch
    # w1_ref   : (3, 3*Cin,  Cout)    bf16 conv1 weights, K ordering = (dw, cin)
    # w2_ref   : (3, 3*Cout, TC)      bf16 conv2 weight tile
    # b*/g*/be*: (1, Cout) / (1, TC)  conv bias, BN gamma, BN beta
    # o_ref    : (N, H, W, TC)        fused block output tile
    # xpad_ref : (N, H+2, W+2, Cin)   f32 scratch (zero-padded pooled input)
    # h1pad_ref: (N, H+2, W+2, Cout)  f32 scratch (zero-padded conv1 output)
    N, H, W, Cin = x_ref.shape
    Cout = w1_ref.shape[-1]
    TC = o_ref.shape[-1]
    M = N * H * W
    inv_m = 1.0 / float(M)

    def conv3x3(pad_ref, w_ref, cin, cout):
        # 3 MXU matmuls (one per kernel row) with K = 3*cin; f32 accumulation.
        acc = jnp.zeros((M, cout), jnp.float32)
        for dh in range(3):
            taps = [pad_ref[:, dh:dh + H, dw:dw + W, :] for dw in range(3)]
            patch = jnp.concatenate(taps, axis=-1).reshape(M, 3 * cin)
            acc = acc + jnp.dot(patch.astype(jnp.bfloat16), w_ref[dh],
                                preferred_element_type=jnp.float32)
        return acc

    def bn_relu(acc, gamma, beta):
        # Training-mode BatchNorm (biased batch variance) fused with ReLU.
        mu = jnp.sum(acc, axis=0, keepdims=True) * inv_m
        var = jnp.sum(acc * acc, axis=0, keepdims=True) * inv_m - mu * mu
        var = jnp.maximum(var, 0.0)
        scale = gamma * jax.lax.rsqrt(var + eps)
        shift = beta - mu * scale
        return jnp.maximum(acc * scale + shift, 0.0)

    # --- grid step 0: conv1 over ALL output channels -> VMEM-resident scratch
    @pl.when(pl.program_id(0) == 0)
    def _():
        xpad_ref[...] = jnp.zeros_like(xpad_ref)
        xpad_ref[:, 1:H + 1, 1:W + 1, :] = x_ref[...]
        acc1 = conv3x3(xpad_ref, w1_ref, Cin, Cout) + b1_ref[...]
        h1 = bn_relu(acc1, g1_ref[...], be1_ref[...])
        h1pad_ref[...] = jnp.zeros_like(h1pad_ref)
        h1pad_ref[:, 1:H + 1, 1:W + 1, :] = h1.reshape(N, H, W, Cout)

    # --- every grid step: conv2 + BN2 + ReLU for this output-channel tile ----
    acc2 = conv3x3(h1pad_ref, w2_ref, Cout, TC) + b2_ref[...]
    o_ref[...] = bn_relu(acc2, g2_ref[...], be2_ref[...]).reshape(N, H, W, TC)


# ----------------------------------------------------------------------------
# Wrapper: one pallas_call for the whole TwoCon block
# ----------------------------------------------------------------------------
def twocon(x, p, *, eps=1e-5):
    """x: (N,H,W,Cin) f32, p: TwoCon params -> (N,H,W,Cout) f32."""
    N, H, W, Cin = x.shape
    Cout = p["conv1"]["w"].shape[-1]

    # Lane-dense conv2 output-channel tile.
    if Cout % 256 == 0:
        TC = 256
    elif Cout % 128 == 0:
        TC = 128
    else:
        TC = Cout
    nct = Cout // TC

    w1 = p["conv1"]["w"].astype(jnp.bfloat16).reshape(3, 3 * Cin, Cout)
    w2 = p["conv2"]["w"].astype(jnp.bfloat16).reshape(3, 3 * Cout, Cout)
    b1 = p["conv1"]["b"].reshape(1, Cout).astype(jnp.float32)
    b2 = p["conv2"]["b"].reshape(1, Cout).astype(jnp.float32)
    g1 = p["bn1"]["gamma"].reshape(1, Cout).astype(jnp.float32)
    g2 = p["bn2"]["gamma"].reshape(1, Cout).astype(jnp.float32)
    be1 = p["bn1"]["beta"].reshape(1, Cout).astype(jnp.float32)
    be2 = p["bn2"]["beta"].reshape(1, Cout).astype(jnp.float32)

    kern = functools.partial(_twocon_kernel, eps=eps)
    return pl.pallas_call(
        kern,
        out_shape=jax.ShapeDtypeStruct((N, H, W, Cout), jnp.float32),
        grid=(nct,),   # only the conv2 Cout-tile axis; batch folded into M
        in_specs=[
            pl.BlockSpec((N, H, W, Cin), lambda c: (0, 0, 0, 0)),
            pl.BlockSpec((3, 3 * Cin, Cout), lambda c: (0, 0, 0)),
            pl.BlockSpec((1, Cout), lambda c: (0, 0)),
            pl.BlockSpec((1, Cout), lambda c: (0, 0)),
            pl.BlockSpec((1, Cout), lambda c: (0, 0)),
            pl.BlockSpec((3, 3 * Cout, TC), lambda c: (0, 0, c)),
            pl.BlockSpec((1, TC), lambda c: (0, c)),
            pl.BlockSpec((1, TC), lambda c: (0, c)),
            pl.BlockSpec((1, TC), lambda c: (0, c)),
        ],
        out_specs=pl.BlockSpec((N, H, W, TC), lambda c: (0, 0, 0, c)),
        scratch_shapes=[
            pltpu.VMEM((N, H + 2, W + 2, Cin), jnp.float32),
            pltpu.VMEM((N, H + 2, W + 2, Cout), jnp.float32),
        ],
        compiler_params=pltpu.CompilerParams(
            # The conv1 scratch is written at step 0 and read by every later
            # step, so this grid axis must execute sequentially on one core.
            dimension_semantics=("arbitrary",),
            # 48 MiB leaves headroom on v7x (64 MiB physical VMEM).
            vmem_limit_bytes=48 * 1024 * 1024,
        ),
    )(x, w1, b1, g1, be1, w2, b2, g2, be2)


def maxpool2x2(x):
    # glue: 2x2 stride-2 max pool (8 KiB of data; negligible vs. the convs)
    N, H, W, C = x.shape
    return x.reshape(N, H // 2, 2, W // 2, 2, C).max(axis=(2, 4))


# ----------------------------------------------------------------------------
# Down module: parameters + forward
# ----------------------------------------------------------------------------
def init_params(key, cin, cout):
    k1, k2 = jax.random.split(key)

    def conv_p(k, ci, co):
        w = jax.random.normal(k, (3, 3, ci, co), jnp.float32)
        w = w * (1.0 / jnp.sqrt(float(9 * ci)))
        return {"w": w, "b": jnp.zeros((co,), jnp.float32)}

    def bn_p(c):
        return {"gamma": jnp.ones((c,), jnp.float32),
                "beta": jnp.zeros((c,), jnp.float32)}

    return {"conv1": conv_p(k1, cin, cout), "bn1": bn_p(cout),
            "conv2": conv_p(k2, cout, cout), "bn2": bn_p(cout)}


def down_fwd(params, x):
    """Down.forward: maxpool(2,2) -> TwoCon (single fused Pallas kernel)."""
    return twocon(maxpool2x2(x), params)


if __name__ == "__main__":
    key = jax.random.PRNGKey(0)
    pkey, xkey = jax.random.split(key)

    CIN, COUT = 4, 128          # Down(4, 128); Cout multiple of 128 = lane-dense
    params = init_params(pkey, CIN, COUT)

    # PyTorch-style NCHW input: (batch=2, channels=4, 16, 16)
    x_nchw = jax.random.normal(xkey, (2, CIN, 16, 16), jnp.float32)
    x_nhwc = jnp.transpose(x_nchw, (0, 2, 3, 1))   # NCHW -> NHWC

    out = jax.jit(down_fwd)(params, x_nhwc)
    out = jax.block_until_ready(out)

    assert out.shape == (2, 8, 8, COUT)            # spatial halved by the pool
    assert bool(jnp.all(jnp.isfinite(out)))
    assert bool(jnp.all(out >= 0.0))               # ReLU output range
    print("KERNEL_OK")
</pallas_src>

<mosaic_0001>
module attributes {stable_mosaic.version = 11 : i64} {
  func.func @_twocon_kernel(%arg0: i32, %arg1: memref<2x8x8x4xf32, #tpu.memory_space<vmem>>, %arg2: memref<3x12x128xbf16, #tpu.memory_space<vmem>>, %arg3: memref<1x128xf32, #tpu.memory_space<vmem>>, %arg4: memref<1x128xf32, #tpu.memory_space<vmem>>, %arg5: memref<1x128xf32, #tpu.memory_space<vmem>>, %arg6: memref<3x384x128xbf16, #tpu.memory_space<vmem>>, %arg7: memref<1x128xf32, #tpu.memory_space<vmem>>, %arg8: memref<1x128xf32, #tpu.memory_space<vmem>>, %arg9: memref<1x128xf32, #tpu.memory_space<vmem>>, %arg10: memref<2x8x8x128xf32, #tpu.memory_space<vmem>>, %arg11: memref<2x10x10x4xf32, #tpu.memory_space<vmem>>, %arg12: memref<2x10x10x128xf32, #tpu.memory_space<vmem>>) attributes {dimension_semantics = [#tpu.dimension_semantics<arbitrary>], iteration_bounds = array<i64: 1>, scalar_prefetch = 0 : i64, scratch_operands = 2 : i64, tpu.core_type = #tpu.core_type<tc>, window_params = [{pipeline_mode = #tpu.pipeline_mode<synchronous>, transform_indices = @transform_0, window_bounds = array<i64: 2, 8, 8, 4>}, {pipeline_mode = #tpu.pipeline_mode<synchronous>, transform_indices = @transform_1, window_bounds = array<i64: 3, 12, 128>}, {pipeline_mode = #tpu.pipeline_mode<synchronous>, transform_indices = @transform_2, window_bounds = array<i64: 1, 128>}, {pipeline_mode = #tpu.pipeline_mode<synchronous>, transform_indices = @transform_3, window_bounds = array<i64: 1, 128>}, {pipeline_mode = #tpu.pipeline_mode<synchronous>, transform_indices = @transform_4, window_bounds = array<i64: 1, 128>}, {transform_indices = @transform_5, window_bounds = array<i64: 3, 384, 128>}, {transform_indices = @transform_6, window_bounds = array<i64: 1, 128>}, {transform_indices = @transform_7, window_bounds = array<i64: 1, 128>}, {transform_indices = @transform_8, window_bounds = array<i64: 1, 128>}, {transform_indices = @transform_9, window_bounds = array<i64: 2, 8, 8, 128>}]} {
    %c0_i32 = arith.constant 0 : i32
    %0 = arith.cmpi eq, %arg0, %c0_i32 : i32
    %1 = arith.extui %0 : i1 to i32
    %c0_i32_0 = arith.constant 0 : i32
    %2 = arith.cmpi ne, %1, %c0_i32_0 : i32
    scf.if %2 {
      %cst_63 = arith.constant 0.000000e+00 : f32
      %66 = vector.broadcast %cst_63 : f32 to vector<2x10x10x4xf32>
      %c0_64 = arith.constant 0 : index
      %c0_65 = arith.constant 0 : index
      %c0_66 = arith.constant 0 : index
      %c0_67 = arith.constant 0 : index
      %67 = vector.load %arg11[%c0_64, %c0_65, %c0_66, %c0_67] : memref<2x10x10x4xf32, #tpu.memory_space<vmem>>, vector<2x10x10x4xf32>
      tpu.vector_store %arg11[%c0_64, %c0_65, %c0_66, %c0_67], %66 {strides = array<i32>} : memref<2x10x10x4xf32, #tpu.memory_space<vmem>>, vector<2x10x10x4xf32>,
      %c0_68 = arith.constant 0 : index
      %c0_69 = arith.constant 0 : index
      %c0_70 = arith.constant 0 : index
      %c0_71 = arith.constant 0 : index
      %68 = vector.load %arg1[%c0_68, %c0_69, %c0_70, %c0_71] : memref<2x8x8x4xf32, #tpu.memory_space<vmem>>, vector<2x8x8x4xf32>
      %c0_72 = arith.constant 0 : index
      %c1_73 = arith.constant 1 : index
      %c1_74 = arith.constant 1 : index
      %c0_75 = arith.constant 0 : index
      %69 = vector.load %arg11[%c0_72, %c1_73, %c1_74, %c0_75] : memref<2x10x10x4xf32, #tpu.memory_space<vmem>>, vector<2x8x8x4xf32>
      tpu.vector_store %arg11[%c0_72, %c1_73, %c1_74, %c0_75], %68 {strides = array<i32>} : memref<2x10x10x4xf32, #tpu.memory_space<vmem>>, vector<2x8x8x4xf32>,
      %cst_76 = arith.constant 0.000000e+00 : f32
      %70 = vector.broadcast %cst_76 : f32 to vector<128x128xf32>
      %c0_77 = arith.constant 0 : index
      %c0_78 = arith.constant 0 : index
      %c0_79 = arith.constant 0 : index
      %c0_80 = arith.constant 0 : index
      %71 = vector.load %arg11[%c0_77, %c0_78, %c0_79, %c0_80] : memref<2x10x10x4xf32, #tpu.memory_space<vmem>>, vector<2x8x8x4xf32>
      %c0_81 = arith.constant 0 : index
      %c0_82 = arith.constant 0 : index
      %c1_83 = arith.constant 1 : index
      %c0_84 = arith.constant 0 : index
      %72 = vector.load %arg11[%c0_81, %c0_82, %c1_83, %c0_84] : memref<2x10x10x4xf32, #tpu.memory_space<vmem>>, vector<2x8x8x4xf32>
      %c0_85 = arith.constant 0 : index
      %c0_86 = arith.constant 0 : index
      %c2_87 = arith.constant 2 : index
      %c0_88 = arith.constant 0 : index
      %73 = vector.load %arg11[%c0_85, %c0_86, %c2_87, %c0_88] : memref<2x10x10x4xf32, #tpu.memory_space<vmem>>, vector<2x8x8x4xf32>
      %74 = tpu.concatenate %71, %72, %73 in 3 : vector<2x8x8x4xf32>, vector<2x8x8x4xf32>, vector<2x8x8x4xf32> -> vector<2x8x8x12xf32>
      %75 = vector.shape_cast %74 : vector<2x8x8x12xf32> to vector<128x12xf32>
      %76 = arith.truncf %75 : vector<128x12xf32> to vector<128x12xbf16>
      %c0_89 = arith.constant 0 : index
      %c0_90 = arith.constant 0 : index
      %c0_91 = arith.constant 0 : index
      %77 = vector.load %arg2[%c0_89, %c0_90, %c0_91] : memref<3x12x128xbf16, #tpu.memory_space<vmem>>, vector<1x12x128xbf16>
      %78 = vector.shape_cast %77 : vector<1x12x128xbf16> to vector<12x128xbf16>
      %cst_92 = arith.constant dense<0.000000e+00> : vector<128x128xf32>
      %79 = tpu.matmul %76, %78, %cst_92 {dimension_numbers = #tpu.dot_dimension_numbers<[1], [0], [0], [1], [0, 0, 1, 1], [], []>} : vector<128x12xbf16>, vector<12x128xbf16>, vector<128x128xf32> -> vector<128x128xf32>
      %80 = arith.addf %70, %79 : vector<128x128xf32>
      %c0_93 = arith.constant 0 : index
      %c1_94 = arith.constant 1 : index
      %c0_95 = arith.constant 0 : index
      %c0_96 = arith.constant 0 : index
      %81 = vector.load %arg11[%c0_93, %c1_94, %c0_95, %c0_96] : memref<2x10x10x4xf32, #tpu.memory_space<vmem>>, vector<2x8x8x4xf32>
      %c0_97 = arith.constant 0 : index
      %c1_98 = arith.constant 1 : index
      %c1_99 = arith.constant 1 : index
      %c0_100 = arith.constant 0 : index
      %82 = vector.load %arg11[%c0_97, %c1_98, %c1_99, %c0_100] : memref<2x10x10x4xf32, #tpu.memory_space<vmem>>, vector<2x8x8x4xf32>
      %c0_101 = arith.constant 0 : index
      %c1_102 = arith.constant 1 : index
      %c2_103 = arith.constant 2 : index
      %c0_104 = arith.constant 0 : index
      %83 = vector.load %arg11[%c0_101, %c1_102, %c2_103, %c0_104] : memref<2x10x10x4xf32, #tpu.memory_space<vmem>>, vector<2x8x8x4xf32>
      %84 = tpu.concatenate %81, %82, %83 in 3 : vector<2x8x8x4xf32>, vector<2x8x8x4xf32>, vector<2x8x8x4xf32> -> vector<2x8x8x12xf32>
      %85 = vector.shape_cast %84 : vector<2x8x8x12xf32> to vector<128x12xf32>
      %86 = arith.truncf %85 : vector<128x12xf32> to vector<128x12xbf16>
      %c1_105 = arith.constant 1 : index
      %c0_106 = arith.constant 0 : index
      %c0_107 = arith.constant 0 : index
      %87 = vector.load %arg2[%c1_105, %c0_106, %c0_107] : memref<3x12x128xbf16, #tpu.memory_space<vmem>>, vector<1x12x128xbf16>
      %88 = vector.shape_cast %87 : vector<1x12x128xbf16> to vector<12x128xbf16>
      %cst_108 = arith.constant dense<0.000000e+00> : vector<128x128xf32>
      %89 = tpu.matmul %86, %88, %cst_108 {dimension_numbers = #tpu.dot_dimension_numbers<[1], [0], [0], [1], [0, 0, 1, 1], [], []>} : vector<128x12xbf16>, vector<12x128xbf16>, vector<128x128xf32> -> vector<128x128xf32>
      %90 = arith.addf %80, %89 : vector<128x128xf32>
      %c0_109 = arith.constant 0 : index
      %c2_110 = arith.constant 2 : index
      %c0_111 = arith.constant 0 : index
      %c0_112 = arith.constant 0 : index
      %91 = vector.load %arg11[%c0_109, %c2_110, %c0_111, %c0_112] : memref<2x10x10x4xf32, #tpu.memory_space<vmem>>, vector<2x8x8x4xf32>
      %c0_113 = arith.constant 0 : index
      %c2_114 = arith.constant 2 : index
      %c1_115 = arith.constant 1 : index
      %c0_116 = arith.constant 0 : index
      %92 = vector.load %arg11[%c0_113, %c2_114, %c1_115, %c0_116] : memref<2x10x10x4xf32, #tpu.memory_space<vmem>>, vector<2x8x8x4xf32>
      %c0_117 = arith.constant 0 : index
      %c2_118 = arith.constant 2 : index
      %c2_119 = arith.constant 2 : index
      %c0_120 = arith.constant 0 : index
      %93 = vector.load %arg11[%c0_117, %c2_118, %c2_119, %c0_120] : memref<2x10x10x4xf32, #tpu.memory_space<vmem>>, vector<2x8x8x4xf32>
      %94 = tpu.concatenate %91, %92, %93 in 3 : vector<2x8x8x4xf32>, vector<2x8x8x4xf32>, vector<2x8x8x4xf32> -> vector<2x8x8x12xf32>
      %95 = vector.shape_cast %94 : vector<2x8x8x12xf32> to vector<128x12xf32>
      %96 = arith.truncf %95 : vector<128x12xf32> to vector<128x12xbf16>
      %c2_121 = arith.constant 2 : index
      %c0_122 = arith.constant 0 : index
      %c0_123 = arith.constant 0 : index
      %97 = vector.load %arg2[%c2_121, %c0_122, %c0_123] : memref<3x12x128xbf16, #tpu.memory_space<vmem>>, vector<1x12x128xbf16>
      %98 = vector.shape_cast %97 : vector<1x12x128xbf16> to vector<12x128xbf16>
      %cst_124 = arith.constant dense<0.000000e+00> : vector<128x128xf32>
      %99 = tpu.matmul %96, %98, %cst_124 {dimension_numbers = #tpu.dot_dimension_numbers<[1], [0], [0], [1], [0, 0, 1, 1], [], []>} : vector<128x12xbf16>, vector<12x128xbf16>, vector<128x128xf32> -> vector<128x128xf32>
      %100 = arith.addf %90, %99 : vector<128x128xf32>
      %c0_125 = arith.constant 0 : index
      %c0_126 = arith.constant 0 : index
      %101 = vector.load %arg3[%c0_125, %c0_126] : memref<1x128xf32, #tpu.memory_space<vmem>>, vector<1x128xf32>
      %102 = vector.broadcast %101 : vector<1x128xf32> to vector<128x128xf32>
      %103 = arith.addf %100, %102 : vector<128x128xf32>
      %c0_127 = arith.constant 0 : index
      %c0_128 = arith.constant 0 : index
      %104 = vector.load %arg4[%c0_127, %c0_128] : memref<1x128xf32, #tpu.memory_space<vmem>>, vector<1x128xf32>
      %c0_129 = arith.constant 0 : index
      %c0_130 = arith.constant 0 : index
      %105 = vector.load %arg5[%c0_129, %c0_130] : memref<1x128xf32, #tpu.memory_space<vmem>>, vector<1x128xf32>
      %cst_131 = arith.constant dense<0.000000e+00> : vector<128xf32>
      %106 = vector.multi_reduction <add>, %103, %cst_131 [0] : vector<128x128xf32> to vector<128xf32>
      %107 = vector.shape_cast %106 : vector<128xf32> to vector<1x128xf32>
      %cst_132 = arith.constant 7.812500e-03 : f32
      %108 = vector.broadcast %cst_132 : f32 to vector<1x128xf32>
      %109 = arith.mulf %107, %108 : vector<1x128xf32>
      %110 = arith.mulf %103, %103 : vector<128x128xf32>
      %cst_133 = arith.constant dense<0.000000e+00> : vector<128xf32>
      %111 = vector.multi_reduction <add>, %110, %cst_133 [0] : vector<128x128xf32> to vector<128xf32>
      %112 = vector.shape_cast %111 : vector<128xf32> to vector<1x128xf32>
      %cst_134 = arith.constant 7.812500e-03 : f32
      %113 = vector.broadcast %cst_134 : f32 to vector<1x128xf32>
      %114 = arith.mulf %112, %113 : vector<1x128xf32>
      %115 = arith.mulf %109, %109 : vector<1x128xf32>
      %116 = arith.subf %114, %115 : vector<1x128xf32>
      %cst_135 = arith.constant 0.000000e+00 : f32
      %117 = vector.broadcast %cst_135 : f32 to vector<1x128xf32>
      %118 = arith.maximumf %116, %117 : vector<1x128xf32>
      %cst_136 = arith.constant 9.99999974E-6 : f32
      %119 = vector.broadcast %cst_136 : f32 to vector<1x128xf32>
      %120 = arith.addf %118, %119 : vector<1x128xf32>
      %121 = math.rsqrt %120 : vector<1x128xf32>
      %122 = arith.mulf %104, %121 : vector<1x128xf32>
      %123 = arith.mulf %109, %122 : vector<1x128xf32>
      %124 = arith.subf %105, %123 : vector<1x128xf32>
      %125 = vector.broadcast %122 : vector<1x128xf32> to vector<128x128xf32>
      %126 = arith.mulf %103, %125 : vector<128x128xf32>
      %127 = vector.broadcast %124 : vector<1x128xf32> to vector<128x128xf32>
      %128 = arith.addf %126, %127 : vector<128x128xf32>
      %cst_137 = arith.constant 0.000000e+00 : f32
      %129 = vector.broadcast %cst_137 : f32 to vector<128x128xf32>
      %130 = arith.maximumf %128, %129 : vector<128x128xf32>
      %cst_138 = arith.constant 0.000000e+00 : f32
      %131 = vector.broadcast %cst_138 : f32 to vector<2x10x10x128xf32>
      %c0_139 = arith.constant 0 : index
      %c0_140 = arith.constant 0 : index
      %c0_141 = arith.constant 0 : index
      %c0_142 = arith.constant 0 : index
      %132 = vector.load %arg12[%c0_139, %c0_140, %c0_141, %c0_142] : memref<2x10x10x128xf32, #tpu.memory_space<vmem>>, vector<2x10x10x128xf32>
      tpu.vector_store %arg12[%c0_139, %c0_140, %c0_141, %c0_142], %131 {strides = array<i32>} : memref<2x10x10x128xf32, #tpu.memory_space<vmem>>, vector<2x10x10x128xf32>,
      %133 = vector.shape_cast %130 : vector<128x128xf32> to vector<2x8x8x128xf32>
      %c0_143 = arith.constant 0 : index
      %c1_144 = arith.constant 1 : index
      %c1_145 = arith.constant 1 : index
      %c0_146 = arith.constant 0 : index
      %134 = vector.load %arg12[%c0_143, %c1_144, %c1_145, %c0_146] : memref<2x10x10x128xf32, #tpu.memory_space<vmem>>, vector<2x8x8x128xf32>
      tpu.vector_store %arg12[%c0_143, %c1_144, %c1_145, %c0_146], %133 {strides = array<i32>} : memref<2x10x10x128xf32, #tpu.memory_space<vmem>>, vector<2x8x8x128xf32>,
    } else {
    }
    %cst = arith.constant 0.000000e+00 : f32
    %3 = vector.broadcast %cst : f32 to vector<128x128xf32>
    %c0 = arith.constant 0 : index
    %c0_1 = arith.constant 0 : index
    %c0_2 = arith.constant 0 : index
    %c0_3 = arith.constant 0 : index
    %4 = vector.load %arg12[%c0, %c0_1, %c0_2, %c0_3] : memref<2x10x10x128xf32, #tpu.memory_space<vmem>>, vector<2x8x8x128xf32>
    %c0_4 = arith.constant 0 : index
    %c0_5 = arith.constant 0 : index
    %c1 = arith.constant 1 : index
    %c0_6 = arith.constant 0 : index
    %5 = vector.load %arg12[%c0_4, %c0_5, %c1, %c0_6] : memref<2x10x10x128xf32, #tpu.memory_space<vmem>>, vector<2x8x8x128xf32>
    %c0_7 = arith.constant 0 : index
    %c0_8 = arith.constant 0 : index
    %c2 = arith.constant 2 : index
    %c0_9 = arith.constant 0 : index
    %6 = vector.load %arg12[%c0_7, %c0_8, %c2, %c0_9] : memref<2x10x10x128xf32, #tpu.memory_space<vmem>>, vector<2x8x8x128xf32>
    %7 = tpu.concatenate %4, %5, %6 in 3 : vector<2x8x8x128xf32>, vector<2x8x8x128xf32>, vector<2x8x8x128xf32> -> vector<2x8x8x384xf32>
    %8 = vector.shape_cast %7 : vector<2x8x8x384xf32> to vector<128x384xf32>
    %9 = arith.truncf %8 : vector<128x384xf32> to vector<128x384xbf16>
    %c0_10 = arith.constant 0 : index
    %c0_11 = arith.constant 0 : index
    %c0_12 = arith.constant 0 : index
    %10 = vector.load %arg6[%c0_10, %c0_11, %c0_12] : memref<3x384x128xbf16, #tpu.memory_space<vmem>>, vector<1x384x128xbf16>
    %11 = vector.shape_cast %10 : vector<1x384x128xbf16> to vector<384x128xbf16>
    %cst_13 = arith.constant dense<0.000000e+00> : vector<128x128xf32>
    %12 = tpu.matmul %9, %11, %cst_13 {dimension_numbers = #tpu.dot_dimension_numbers<[1], [0], [0], [1], [0, 0, 1, 1], [], []>} : vector<128x384xbf16>, vector<384x128xbf16>, vector<128x128xf32> -> vector<128x128xf32>
    %13 = arith.addf %3, %12 : vector<128x128xf32>
    %c0_14 = arith.constant 0 : index
    %c1_15 = arith.constant 1 : index
    %c0_16 = arith.constant 0 : index
    %c0_17 = arith.constant 0 : index
    %14 = vector.load %arg12[%c0_14, %c1_15, %c0_16, %c0_17] : memref<2x10x10x128xf32, #tpu.memory_space<vmem>>, vector<2x8x8x128xf32>
    %c0_18 = arith.constant 0 : index
    %c1_19 = arith.constant 1 : index
    %c1_20 = arith.constant 1 : index
    %c0_21 = arith.constant 0 : index
    %15 = vector.load %arg12[%c0_18, %c1_19, %c1_20, %c0_21] : memref<2x10x10x128xf32, #tpu.memory_space<vmem>>, vector<2x8x8x128xf32>
    %c0_22 = arith.constant 0 : index
    %c1_23 = arith.constant 1 : index
    %c2_24 = arith.constant 2 : index
    %c0_25 = arith.constant 0 : index
    %16 = vector.load %arg12[%c0_22, %c1_23, %c2_24, %c0_25] : memref<2x10x10x128xf32, #tpu.memory_space<vmem>>, vector<2x8x8x128xf32>
    %17 = tpu.concatenate %14, %15, %16 in 3 : vector<2x8x8x128xf32>, vector<2x8x8x128xf32>, vector<2x8x8x128xf32> -> vector<2x8x8x384xf32>
    %18 = vector.shape_cast %17 : vector<2x8x8x384xf32> to vector<128x384xf32>
    %19 = arith.truncf %18 : vector<128x384xf32> to vector<128x384xbf16>
    %c1_26 = arith.constant 1 : index
    %c0_27 = arith.constant 0 : index
    %c0_28 = arith.constant 0 : index
    %20 = vector.load %arg6[%c1_26, %c0_27, %c0_28] : memref<3x384x128xbf16, #tpu.memory_space<vmem>>, vector<1x384x128xbf16>
    %21 = vector.shape_cast %20 : vector<1x384x128xbf16> to vector<384x128xbf16>
    %cst_29 = arith.constant dense<0.000000e+00> : vector<128x128xf32>
    %22 = tpu.matmul %19, %21, %cst_29 {dimension_numbers = #tpu.dot_dimension_numbers<[1], [0], [0], [1], [0, 0, 1, 1], [], []>} : vector<128x384xbf16>, vector<384x128xbf16>, vector<128x128xf32> -> vector<128x128xf32>
    %23 = arith.addf %13, %22 : vector<128x128xf32>
    %c0_30 = arith.constant 0 : index
    %c2_31 = arith.constant 2 : index
    %c0_32 = arith.constant 0 : index
    %c0_33 = arith.constant 0 : index
    %24 = vector.load %arg12[%c0_30, %c2_31, %c0_32, %c0_33] : memref<2x10x10x128xf32, #tpu.memory_space<vmem>>, vector<2x8x8x128xf32>
    %c0_34 = arith.constant 0 : index
    %c2_35 = arith.constant 2 : index
    %c1_36 = arith.constant 1 : index
    %c0_37 = arith.constant 0 : index
    %25 = vector.load %arg12[%c0_34, %c2_35, %c1_36, %c0_37] : memref<2x10x10x128xf32, #tpu.memory_space<vmem>>, vector<2x8x8x128xf32>
    %c0_38 = arith.constant 0 : index
    %c2_39 = arith.constant 2 : index
    %c2_40 = arith.constant 2 : index
    %c0_41 = arith.constant 0 : index
    %26 = vector.load %arg12[%c0_38, %c2_39, %c2_40, %c0_41] : memref<2x10x10x128xf32, #tpu.memory_space<vmem>>, vector<2x8x8x128xf32>
    %27 = tpu.concatenate %24, %25, %26 in 3 : vector<2x8x8x128xf32>, vector<2x8x8x128xf32>, vector<2x8x8x128xf32> -> vector<2x8x8x384xf32>
    %28 = vector.shape_cast %27 : vector<2x8x8x384xf32> to vector<128x384xf32>
    %29 = arith.truncf %28 : vector<128x384xf32> to vector<128x384xbf16>
    %c2_42 = arith.constant 2 : index
    %c0_43 = arith.constant 0 : index
    %c0_44 = arith.constant 0 : index
    %30 = vector.load %arg6[%c2_42, %c0_43, %c0_44] : memref<3x384x128xbf16, #tpu.memory_space<vmem>>, vector<1x384x128xbf16>
    %31 = vector.shape_cast %30 : vector<1x384x128xbf16> to vector<384x128xbf16>
    %cst_45 = arith.constant dense<0.000000e+00> : vector<128x128xf32>
    %32 = tpu.matmul %29, %31, %cst_45 {dimension_numbers = #tpu.dot_dimension_numbers<[1], [0], [0], [1], [0, 0, 1, 1], [], []>} : vector<128x384xbf16>, vector<384x128xbf16>, vector<128x128xf32> -> vector<128x128xf32>
    %33 = arith.addf %23, %32 : vector<128x128xf32>
    %c0_46 = arith.constant 0 : index
    %c0_47 = arith.constant 0 : index
    %34 = vector.load %arg7[%c0_46, %c0_47] : memref<1x128xf32, #tpu.memory_space<vmem>>, vector<1x128xf32>
    %35 = vector.broadcast %34 : vector<1x128xf32> to vector<128x128xf32>
    %36 = arith.addf %33, %35 : vector<128x128xf32>
    %c0_48 = arith.constant 0 : index
    %c0_49 = arith.constant 0 : index
    %37 = vector.load %arg8[%c0_48, %c0_49] : memref<1x128xf32, #tpu.memory_space<vmem>>, vector<1x128xf32>
    %c0_50 = arith.constant 0 : index
    %c0_51 = arith.constant 0 : index
    %38 = vector.load %arg9[%c0_50, %c0_51] : memref<1x128xf32, #tpu.memory_space<vmem>>, vector<1x128xf32>
    %cst_52 = arith.constant dense<0.000000e+00> : vector<128xf32>
    %39 = vector.multi_reduction <add>, %36, %cst_52 [0] : vector<128x128xf32> to vector<128xf32>
    %40 = vector.shape_cast %39 : vector<128xf32> to vector<1x128xf32>
    %cst_53 = arith.constant 7.812500e-03 : f32
    %41 = vector.broadcast %cst_53 : f32 to vector<1x128xf32>
    %42 = arith.mulf %40, %41 : vector<1x128xf32>
    %43 = arith.mulf %36, %36 : vector<128x128xf32>
    %cst_54 = arith.constant dense<0.000000e+00> : vector<128xf32>
    %44 = vector.multi_reduction <add>, %43, %cst_54 [0] : vector<128x128xf32> to vector<128xf32>
    %45 = vector.shape_cast %44 : vector<128xf32> to vector<1x128xf32>
    %cst_55 = arith.constant 7.812500e-03 : f32
    %46 = vector.broadcast %cst_55 : f32 to vector<1x128xf32>
    %47 = arith.mulf %45, %46 : vector<1x128xf32>
    %48 = arith.mulf %42, %42 : vector<1x128xf32>
    %49 = arith.subf %47, %48 : vector<1x128xf32>
    %cst_56 = arith.constant 0.000000e+00 : f32
    %50 = vector.broadcast %cst_56 : f32 to vector<1x128xf32>
    %51 = arith.maximumf %49, %50 : vector<1x128xf32>
    %cst_57 = arith.constant 9.99999974E-6 : f32
    %52 = vector.broadcast %cst_57 : f32 to vector<1x128xf32>
    %53 = arith.addf %51, %52 : vector<1x128xf32>
    %54 = math.rsqrt %53 : vector<1x128xf32>
    %55 = arith.mulf %37, %54 : vector<1x128xf32>
    %56 = arith.mulf %42, %55 : vector<1x128xf32>
    %57 = arith.subf %38, %56 : vector<1x128xf32>
    %58 = vector.broadcast %55 : vector<1x128xf32> to vector<128x128xf32>
    %59 = arith.mulf %36, %58 : vector<128x128xf32>
    %60 = vector.broadcast %57 : vector<1x128xf32> to vector<128x128xf32>
    %61 = arith.addf %59, %60 : vector<128x128xf32>
    %cst_58 = arith.constant 0.000000e+00 : f32
    %62 = vector.broadcast %cst_58 : f32 to vector<128x128xf32>
    %63 = arith.maximumf %61, %62 : vector<128x128xf32>
    %64 = vector.shape_cast %63 : vector<128x128xf32> to vector<2x8x8x128xf32>
    %c0_59 = arith.constant 0 : index
    %c0_60 = arith.constant 0 : index
    %c0_61 = arith.constant 0 : index
    %c0_62 = arith.constant 0 : index
    %65 = vector.load %arg10[%c0_59, %c0_60, %c0_61, %c0_62] : memref<2x8x8x128xf32, #tpu.memory_space<vmem>>, vector<2x8x8x128xf32>
    tpu.vector_store %arg10[%c0_59, %c0_60, %c0_61, %c0_62], %64 {strides = array<i32>} : memref<2x8x8x128xf32, #tpu.memory_space<vmem>>, vector<2x8x8x128xf32>,
    return
  }
  func.func @transform_0(%arg0: i32) -> (i32, i32, i32, i32) {
    %c0_i32 = arith.constant 0 : i32
    %c0_i32_0 = arith.constant 0 : i32
    %c0_i32_1 = arith.constant 0 : i32
    %c0_i32_2 = arith.constant 0 : i32
    %c0_i32_3 = arith.constant 0 : i32
    return %c0_i32, %c0_i32_0, %c0_i32_1, %c0_i32_2 : i32, i32, i32, i32
  }
  func.func @transform_1(%arg0: i32) -> (i32, i32, i32) {
    %c0_i32 = arith.constant 0 : i32
    %c0_i32_0 = arith.constant 0 : i32
    %c0_i32_1 = arith.constant 0 : i32
    %c0_i32_2 = arith.constant 0 : i32
    return %c0_i32, %c0_i32_0, %c0_i32_1 : i32, i32, i32
  }
  func.func @transform_2(%arg0: i32) -> (i32, i32) {
    %c0_i32 = arith.constant 0 : i32
    %c0_i32_0 = arith.constant 0 : i32
    %c0_i32_1 = arith.constant 0 : i32
    return %c0_i32, %c0_i32_0 : i32, i32
  }
  func.func @transform_3(%arg0: i32) -> (i32, i32) {
    %c0_i32 = arith.constant 0 : i32
    %c0_i32_0 = arith.constant 0 : i32
    %c0_i32_1 = arith.constant 0 : i32
    return %c0_i32, %c0_i32_0 : i32, i32
  }
  func.func @transform_4(%arg0: i32) -> (i32, i32) {
    %c0_i32 = arith.constant 0 : i32
    %c0_i32_0 = arith.constant 0 : i32
    %c0_i32_1 = arith.constant 0 : i32
    return %c0_i32, %c0_i32_0 : i32, i32
  }
  func.func @transform_5(%arg0: i32) -> (i32, i32, i32) {
    %c0_i32 = arith.constant 0 : i32
    %c0_i32_0 = arith.constant 0 : i32
    %c0_i32_1 = arith.constant 0 : i32
    return %c0_i32, %c0_i32_0, %arg0 : i32, i32, i32
  }
  func.func @transform_6(%arg0: i32) -> (i32, i32) {
    %c0_i32 = arith.constant 0 : i32
    %c0_i32_0 = arith.constant 0 : i32
    return %c0_i32, %arg0 : i32, i32
  }
  func.func @transform_7(%arg0: i32) -> (i32, i32) {
    %c0_i32 = arith.constant 0 : i32
    %c0_i32_0 = arith.constant 0 : i32
    return %c0_i32, %arg0 : i32, i32
  }
  func.func @transform_8(%arg0: i32) -> (i32, i32) {
    %c0_i32 = arith.constant 0 : i32
    %c0_i32_0 = arith.constant 0 : i32
    return %c0_i32, %arg0 : i32, i32
  }
  func.func @transform_9(%arg0: i32) -> (i32, i32, i32, i32) {
    %c0_i32 = arith.constant 0 : i32
    %c0_i32_0 = arith.constant 0 : i32
    %c0_i32_1 = arith.constant 0 : i32
    %c0_i32_2 = arith.constant 0 : i32
    return %c0_i32, %c0_i32_0, %c0_i32_1, %arg0 : i32, i32, i32, i32
  }
}

</mosaic_0001>

<bundles_post_ra>
// kernel: down_fwd.1
= control target key start
LH: loop header
LB: loop body
LE: loop exit
PB: predicated region body
PF: predicated region fallthrough
CT: control target
= control target key end

     0   :  { %vm38_vm0 = vcmask 31744   ;;  %vm40_vm1 = vcmask 25600   ;;  %v4079_v2 = vmov 0.0   ;;  %vm581_vm2 = vcmask 1045504   ;;  %s4081_s22 = smov 4   ;;  %s5469_s0 = inlined_call_operand.vmem [shape: f32[2,8,8,4], index: 0, kind: input, shape index: {}]   ;;  %s5470_s1 = inlined_call_operand.vmem [shape: bf16[3,12,128], index: 1, kind: input, shape index: {}]   ;;  %s5471_s2 = inlined_call_operand.vmem [shape: f32[1,128], index: 2, kind: input, shape index: {}]   ;;  %s5472_s3 = inlined_call_operand.vmem [shape: f32[1,128], index: 3, kind: input, shape index: {}]   ;;  %s5473_s4 = inlined_call_operand.vmem [shape: f32[1,128], index: 4, kind: input, shape index: {}]   ;;  %s5474_s5 = inlined_call_operand.vmem [shape: bf16[3,384,128], index: 5, kind: input, shape index: {}]   ;;  %s5475_s6 = inlined_call_operand.vmem [shape: f32[1,128], index: 6, kind: input, shape index: {}]   ;;  %s5476_s7 = inlined_call_operand.vmem [shape: f32[1,128], index: 7, kind: input, shape index: {}]   ;;  %s5477_s8 = inlined_call_operand.vmem [shape: f32[1,128], index: 8, kind: input, shape index: {}]   ;;  %s5478_s9 = inlined_call_operand.hbm [shape: f32[2,8,8,128], index: 9, kind: output, shape index: {}]  }
   0x1   :  { %v4137_v0 = vld [vmem:[%s5469_s0] sm:$0xff]  ;;  %v4142_v1 = vld [vmem:[%s5469_s0 + $0x8] sm:$0xff]  ;;  %42 = vst.msk [vmem:[#allocation2 + $0x10] sm:$0xff] %vm38_vm0, %v4079_v2  ;;  %44 = vst.msk [vmem:[#allocation2 + $0x20] sm:$0xff] %vm38_vm0, %v4079_v2 }
   0x2   :  { %43 = vst.msk [vmem:[#allocation2 + $0x18] sm:$0x3] %vm40_vm1, %v4079_v2  ;;  %45 = vst.msk [vmem:[#allocation2 + $0x28] sm:$0x3] %vm40_vm1, %v4079_v2  ;;  %v82_v3 = vld [vmem:[%s5469_s0 + $0x10] sm:$0xff]  ;;  %v83_v4 = vld [vmem:[%s5469_s0 + $0x18] sm:$0xff] }
   0x3   :  { %39 = vst.msk [vmem:[#allocation2] sm:$0xff] %vm38_vm0, %v4079_v2  ;;  %46 = vst.msk [vmem:[#allocation2 + $0x30] sm:$0xff] %vm38_vm0, %v4079_v2  ;;  %v86_v5 = vld [vmem:[%s5469_s0 + $0x30] sm:$0xff]  ;;  %v87_v6 = vld [vmem:[%s5469_s0 + $0x38] sm:$0xff] }
   0x4   :  { %41 = vst.msk [vmem:[#allocation2 + $0x8] sm:$0x3] %vm40_vm1, %v4079_v2  ;;  %47 = vst.msk [vmem:[#allocation2 + $0x38] sm:$0x3] %vm40_vm1, %v4079_v2  ;;  %v84_v7 = vld [vmem:[%s5469_s0 + $0x20] sm:$0xff]  ;;  %v85_v8 = vld [vmem:[%s5469_s0 + $0x28] sm:$0xff] }
   0x5   :  { %48 = vst.msk [vmem:[#allocation2 + $0x40] sm:$0xff] %vm38_vm0, %v4079_v2  ;;  %50 = vst.msk [vmem:[#allocation2 + $0x50] sm:$0xff] %vm38_vm0, %v4079_v2  ;;  %v90_v9 = vld [vmem:[%s5469_s0 + $0x50] sm:$0xff]  ;;  %v91_v10 = vld [vmem:[%s5469_s0 + $0x58] sm:$0xff] }
   0x6   :  { %49 = vst.msk [vmem:[#allocation2 + $0x48] sm:$0x3] %vm40_vm1, %v4079_v2  ;;  %51 = vst.msk [vmem:[#allocation2 + $0x58] sm:$0x3] %vm40_vm1, %v4079_v2  ;;  %v88_v11 = vld [vmem:[%s5469_s0 + $0x40] sm:$0xff]  ;;  %v89_v12 = vld [vmem:[%s5469_s0 + $0x48] sm:$0xff] }
   0x7   :  { %52 = vst.msk [vmem:[#allocation2 + $0x60] sm:$0xff] %vm38_vm0, %v4079_v2  ;;  %54 = vst.msk [vmem:[#allocation2 + $0x70] sm:$0xff] %vm38_vm0, %v4079_v2  ;;  %v94_v13 = vld [vmem:[%s5469_s0 + $0x70] sm:$0xff]  ;;  %v95_v14 = vld [vmem:[%s5469_s0 + $0x78] sm:$0xff] }
   0x8   :  { %53 = vst.msk [vmem:[#allocation2 + $0x68] sm:$0x3] %vm40_vm1, %v4079_v2  ;;  %55 = vst.msk [vmem:[#allocation2 + $0x78] sm:$0x3] %vm40_vm1, %v4079_v2  ;;  %v92_v15 = vld [vmem:[%s5469_s0 + $0x60] sm:$0xff]  ;;  %v93_v16 = vld [vmem:[%s5469_s0 + $0x68] sm:$0xff] }
   0x9   :  { %56 = vst.msk [vmem:[#allocation2 + $0x80] sm:$0xff] %vm38_vm0, %v4079_v2  ;;  %58 = vst.msk [vmem:[#allocation2 + $0x90] sm:$0xff] %vm38_vm0, %v4079_v2  ;;  %v3975_v17 = vld [vmem:[%s5470_s1 + $0x8] sm:$0x3f]   ;;  %s4080_s0 = smov 8  }
   0xa   :  { %57 = vst.msk [vmem:[#allocation2 + $0x88] sm:$0x3] %vm40_vm1, %v4079_v2  ;;  %59 = vst.msk [vmem:[#allocation2 + $0x98] sm:$0x3] %vm40_vm1, %v4079_v2  ;;  %3727 = vmatprep.subr.msk.bf16.mxu0 %vm581_vm2, %v3975_v17  ;;  %v583_v18 = vsel %vm581_vm2, %v3975_v17, 0 }
   0xb   :  { %60 = vst.msk [vmem:[#allocation2 + $0xa0] sm:$0xff] %vm38_vm0, %v4079_v2  ;;  %62 = vst.msk [vmem:[#allocation2 + $0xb0] sm:$0xff] %vm38_vm0, %v4079_v2  ;;  %3434 = vmatpush3.bf16.msra.mxu0 %v583_v18  ;;  %v4369_v48 = vld [vmem:[%s5470_s1] sm:$0x3f]  }
   0xc   :  { %61 = vst.msk [vmem:[#allocation2 + $0xa8] sm:$0x3] %vm40_vm1, %v4079_v2  ;;  %63 = vst.msk [vmem:[#allocation2 + $0xb8] sm:$0x3] %vm40_vm1, %v4079_v2  ;;  %3728 = vmatprep.subr.msk.bf16.mxu0 %vm581_vm2, %v4369_v48 }
   0xd   :  { %64 = vst.msk [vmem:[#allocation2 + $0xc0] sm:$0xff] %vm38_vm0, %v4079_v2  ;;  %66 = vst.msk [vmem:[#allocation2 + $0xd0] sm:$0xff] %vm38_vm0, %v4079_v2 }
   0xe   :  { %65 = vst.msk [vmem:[#allocation2 + $0xc8] sm:$0x3] %vm40_vm1, %v4079_v2  ;;  %67 = vst.msk [vmem:[#allocation2 + $0xd8] sm:$0x3] %vm40_vm1, %v4079_v2 }
   0xf   :  { %68 = vst.msk [vmem:[#allocation2 + $0xe0] sm:$0xff] %vm38_vm0, %v4079_v2  ;;  %70 = vst.msk [vmem:[#allocation2 + $0xf0] sm:$0xff] %vm38_vm0, %v4079_v2 }
  0x10   :  { %69 = vst.msk [vmem:[#allocation2 + $0xe8] sm:$0x3] %vm40_vm1, %v4079_v2  ;;  %71 = vst.msk [vmem:[#allocation2 + $0xf8] sm:$0x3] %vm40_vm1, %v4079_v2 }
  0x11   :  { %72 = vst.msk [vmem:[#allocation2 + $0x100] sm:$0xff] %vm38_vm0, %v4079_v2  ;;  %74 = vst.msk [vmem:[#allocation2 + $0x110] sm:$0xff] %vm38_vm0, %v4079_v2 }
  0x12   :  { %73 = vst.msk [vmem:[#allocation2 + $0x108] sm:$0x3] %vm40_vm1, %v4079_v2  ;;  %75 = vst.msk [vmem:[#allocation2 + $0x118] sm:$0x3] %vm40_vm1, %v4079_v2 }
  0x13   :  { %76 = vst.msk [vmem:[#allocation2 + $0x120] sm:$0xff] %vm38_vm0, %v4079_v2  ;;  %78 = vst.msk [vmem:[#allocation2 + $0x130] sm:$0xff] %vm38_vm0, %v4079_v2 }
  0x14   :  { %77 = vst.msk [vmem:[#allocation2 + $0x128] sm:$0x3] %vm40_vm1, %v4079_v2  ;;  %79 = vst.msk [vmem:[#allocation2 + $0x138] sm:$0x3] %vm40_vm1, %v4079_v2 }
  0x15   :  { %1329 = vst [vmem:[#allocation3] sm:$0xff] %v4079_v2  ;;  %1330 = vst [vmem:[#allocation3 + $0x8] sm:$0x3] %v4079_v2 }
  0x16   :  { %1331 = vst [vmem:[#allocation3 + $0x10] sm:$0xff] %v4079_v2  ;;  %1332 = vst [vmem:[#allocation3 + $0x18] sm:$0x3] %v4079_v2 }
  0x17   :  { %1333 = vst [vmem:[#allocation3 + $0x20] sm:$0xff] %v4079_v2  ;;  %1334 = vst [vmem:[#allocation3 + $0x28] sm:$0x3] %v4079_v2 }
  0x18   :  { %1335 = vst [vmem:[#allocation3 + $0x30] sm:$0xff] %v4079_v2  ;;  %1336 = vst [vmem:[#allocation3 + $0x38] sm:$0x3] %v4079_v2 }
  0x19   :  { %1337 = vst [vmem:[#allocation3 + $0x40] sm:$0xff] %v4079_v2  ;;  %1338 = vst [vmem:[#allocation3 + $0x48] sm:$0x3] %v4079_v2 }
  0x1a   :  { %1339 = vst [vmem:[#allocation3 + $0x50] sm:$0xff] %v4079_v2  ;;  %1340 = vst [vmem:[#allocation3 + $0x58] sm:$0x3] %v4079_v2 }
  0x1b   :  { %1341 = vst [vmem:[#allocation3 + $0x60] sm:$0xff] %v4079_v2  ;;  %1342 = vst [vmem:[#allocation3 + $0x68] sm:$0x3] %v4079_v2 }
  0x1c   :  { %1343 = vst [vmem:[#allocation3 + $0x70] sm:$0xff] %v4079_v2  ;;  %1344 = vst [vmem:[#allocation3 + $0x78] sm:$0x3] %v4079_v2 }
  0x1d   :  { %1345 = vst [vmem:[#allocation3 + $0x80] sm:$0xff] %v4079_v2  ;;  %1346 = vst [vmem:[#allocation3 + $0x88] sm:$0x3] %v4079_v2 }
  0x1e   :  { %1347 = vst [vmem:[#allocation3 + $0x90] sm:$0xff] %v4079_v2  ;;  %1348 = vst [vmem:[#allocation3 + $0x98] sm:$0x3] %v4079_v2 }
  0x1f   :  { %1349 = vst [vmem:[#allocation3 + $0xa0] sm:$0xff] %v4079_v2  ;;  %1350 = vst [vmem:[#allocation3 + $0xa8] sm:$0x3] %v4079_v2 }
  0x20   :  { %1351 = vst [vmem:[#allocation3 + $0xb0] sm:$0xff] %v4079_v2  ;;  %1352 = vst [vmem:[#allocation3 + $0xb8] sm:$0x3] %v4079_v2 }
  0x21   :  { %1353 = vst [vmem:[#allocation3 + $0xc0] sm:$0xff] %v4079_v2  ;;  %1354 = vst [vmem:[#allocation3 + $0xc8] sm:$0x3] %v4079_v2 }
  0x22   :  { %1355 = vst [vmem:[#allocation3 + $0xd0] sm:$0xff] %v4079_v2  ;;  %1356 = vst [vmem:[#allocation3 + $0xd8] sm:$0x3] %v4079_v2 }
  0x23   :  { %1357 = vst [vmem:[#allocation3 + $0xe0] sm:$0xff] %v4079_v2  ;;  %1358 = vst [vmem:[#allocation3 + $0xe8] sm:$0x3] %v4079_v2 }
  0x24   :  { %1359 = vst [vmem:[#allocation3 + $0xf0] sm:$0xff] %v4079_v2  ;;  %1360 = vst [vmem:[#allocation3 + $0xf8] sm:$0x3] %v4079_v2 }
  0x25   :  { %1361 = vst [vmem:[#allocation3 + $0x100] sm:$0xff] %v4079_v2  ;;  %1362 = vst [vmem:[#allocation3 + $0x108] sm:$0x3] %v4079_v2 }
  0x26   :  { %1363 = vst [vmem:[#allocation3 + $0x110] sm:$0xff] %v4079_v2  ;;  %1364 = vst [vmem:[#allocation3 + $0x118] sm:$0x3] %v4079_v2 }
  0x27   :  { %1365 = vst [vmem:[#allocation3 + $0x120] sm:$0xff] %v4079_v2  ;;  %1366 = vst [vmem:[#allocation3 + $0x128] sm:$0x3] %v4079_v2 }
  0x28   :  { %1367 = vst [vmem:[#allocation3 + $0x130] sm:$0xff] %v4079_v2  ;;  %1368 = vst [vmem:[#allocation3 + $0x138] sm:$0x3] %v4079_v2 }
  0x29   :  { %97 = vst.msk [vmem:[#allocation2 + $0x11] sm:$0xff] %vm38_vm0, %v4137_v0  ;;  %98 = vst.msk [vmem:[#allocation2 + $0x21] sm:$0xff] %vm38_vm0, %v4142_v1 }
  0x2a   :  { %99 = vst.msk [vmem:[#allocation2 + $0x31] sm:$0xff] %vm38_vm0, %v82_v3  ;;  %100 = vst.msk [vmem:[#allocation2 + $0x41] sm:$0xff] %vm38_vm0, %v83_v4  ;;  %v129_v3 = vld [vmem:[#allocation2 + $0x1] sm:$0xff] }
  0x2b   :  { %103 = vst.msk [vmem:[#allocation2 + $0x71] sm:$0xff] %vm38_vm0, %v86_v5  ;;  %104 = vst.msk [vmem:[#allocation2 + $0x81] sm:$0xff] %vm38_vm0, %v87_v6 }
  0x2c   :  { %101 = vst.msk [vmem:[#allocation2 + $0x51] sm:$0xff] %vm38_vm0, %v84_v7  ;;  %102 = vst.msk [vmem:[#allocation2 + $0x61] sm:$0xff] %vm38_vm0, %v85_v8  ;;  %v145_v7 = vld [vmem:[#allocation2 + $0x2] sm:$0xff] }
  0x2d   :  { %107 = vst.msk [vmem:[#allocation2 + $0xd1] sm:$0xff] %vm38_vm0, %v90_v9  ;;  %108 = vst.msk [vmem:[#allocation2 + $0xe1] sm:$0xff] %vm38_vm0, %v91_v10 }
  0x2e   :  { %105 = vst.msk [vmem:[#allocation2 + $0xb1] sm:$0xff] %vm38_vm0, %v88_v11  ;;  %106 = vst.msk [vmem:[#allocation2 + $0xc1] sm:$0xff] %vm38_vm0, %v89_v12 }
  0x2f   :  { %111 = vst.msk [vmem:[#allocation2 + $0x111] sm:$0xff] %vm38_vm0, %v94_v13  ;;  %112 = vst.msk [vmem:[#allocation2 + $0x121] sm:$0xff] %vm38_vm0, %v95_v14  ;;  %v137_v13 = vld [vmem:[#allocation2 + $0xa1] sm:$0xff] }
  0x30   :  { %109 = vst.msk [vmem:[#allocation2 + $0xf1] sm:$0xff] %vm38_vm0, %v92_v15  ;;  %110 = vst.msk [vmem:[#allocation2 + $0x101] sm:$0xff] %vm38_vm0, %v93_v16  ;;  %v4329_v19 = vld [vmem:[#allocation2 + $0x12] sm:$0xff]  ;;  %v4331_v20 = vld [vmem:[#allocation2 + $0x22] sm:$0xff] }
  0x31   :  { %v4333_v21 = vld [vmem:[#allocation2 + $0x11] sm:$0xff]  ;;  %v3745_v22 = vpack.i.bf16 %v4331_v20, %v4329_v19  ;;  %v4337_v23 = vld [vmem:[#allocation2 + $0x21] sm:$0xff]  ;;  %v3825_v9 = vpack.i.bf16 %v4329_v19, %v145_v7 }
  0x32   :  { %v4339_v24 = vld [vmem:[#allocation2 + $0x32] sm:$0xff]  ;;  %v4341_v25 = vld [vmem:[#allocation2 + $0x42] sm:$0xff]  ;;  %v3735_v26 = vpack.i.bf16 %v4337_v23, %v4333_v21  ;;  %v3815_v6 = vpack.i.bf16 %v4333_v21, %v129_v3 }
  0x33   :  { %v350_v27 = vld [vmem:[#allocation2 + $0x31] sm:$0xff]  ;;  %v4345_v28 = vld [vmem:[#allocation2 + $0x41] sm:$0xff]  ;;  %3746 = vrot.lane.b32.xlu1 %v3745_v22, %s4080_s0  ;;  %v3750_v29 = vpack.i.bf16 %v4341_v25, %v4339_v24  ;;  %v3830_v8 = vpack.i.bf16 %v4339_v24, %v4331_v20 }
  0x34   :  { %3736 = vrot.lane.b32.xlu0 %v3735_v26, %s4081_s22  ;;  %v3740_v30 = vpack.i.bf16 %v4345_v28, %v350_v27  ;;  %v354_v31 = vld [vmem:[#allocation2 + $0x71] sm:$0xff]  ;;  %v4352_v32 = vld [vmem:[#allocation2 + $0x81] sm:$0xff]  ;;  %v3820_v5 = vpack.i.bf16 %v350_v27, %v4337_v23 }
  0x35   :  { %v352_v33 = vld [vmem:[#allocation2 + $0x51] sm:$0xff]  ;;  %v353_v34 = vld [vmem:[#allocation2 + $0x61] sm:$0xff]  ;;  %v3760_v35 = vpack.i.bf16 %v4352_v32, %v354_v31 }
  0x36   :  { %v3755_v36 = vpack.i.bf16 %v353_v34, %v352_v33  ;;  %v370_v37 = vld [vmem:[#allocation2 + $0x72] sm:$0xff]  ;;  %v4357_v38 = vld [vmem:[#allocation2 + $0x82] sm:$0xff]  ;;  %v3840_v10 = vpack.i.bf16 %v354_v31, %v353_v34  ;;  %v3835_v11 = vpack.i.bf16 %v352_v33, %v4345_v28 }
  0x37   :  { %3751 = vrot.lane.b32.xlu1 %v3750_v29, %s4080_s0  ;;  %v368_v39 = vld [vmem:[#allocation2 + $0x52] sm:$0xff]  ;;  %v369_v40 = vld [vmem:[#allocation2 + $0x62] sm:$0xff]  ;;  %v3770_v41 = vpack.i.bf16 %v4357_v38, %v370_v37 }
  0x38   :  { %3741 = vrot.lane.b32.xlu0 %v3740_v30, %s4081_s22  ;;  %v3765_v42 = vpack.i.bf16 %v369_v40, %v368_v39  ;;  %v358_v43 = vld [vmem:[#allocation2 + $0xd1] sm:$0xff]  ;;  %v4362_v44 = vld [vmem:[#allocation2 + $0xe1] sm:$0xff]  ;;  %v3850_v12 = vpack.i.bf16 %v370_v37, %v369_v40  ;;  %v3845_v14 = vpack.i.bf16 %v368_v39, %v4341_v25 }
  0x39   :  { %v356_v45 = vld [vmem:[#allocation2 + $0xb1] sm:$0xff]  ;;  %v357_v46 = vld [vmem:[#allocation2 + $0xc1] sm:$0xff]  ;;  %v3780_v47 = vpack.i.bf16 %v4362_v44, %v358_v43 }
  0x3a   :  { %v3775_v49 = vpack.i.bf16 %v357_v46, %v356_v45  ;;  %v374_v50 = vld [vmem:[#allocation2 + $0xd2] sm:$0xff]  ;;  %v375_v51 = vld [vmem:[#allocation2 + $0xe2] sm:$0xff]  ;;  %v3860_v15 = vpack.i.bf16 %v358_v43, %v357_v46  ;;  %v3855_v17 = vpack.i.bf16 %v356_v45, %v137_v13 }
  0x3b   :  { %3761 = vrot.lane.b32.xlu1 %v3760_v35, %s4081_s22  ;;  %v372_v52 = vld [vmem:[#allocation2 + $0xb2] sm:$0xff]  ;;  %v373_v53 = vld [vmem:[#allocation2 + $0xc2] sm:$0xff]  ;;  %v3790_v56 = vpack.i.bf16 %v375_v51, %v374_v50 }
  0x3c   :  { %3756 = vrot.lane.b32.xlu0 %v3755_v36, %s4081_s22  ;;  %v362_v54 = vld [vmem:[#allocation2 + $0x111] sm:$0xff]  ;;  %v4374_v55 = vld [vmem:[#allocation2 + $0x121] sm:$0xff]  ;;  %v3785_v59 = vpack.i.bf16 %v373_v53, %v372_v52  ;;  %v3870_v18 = vpack.i.bf16 %v374_v50, %v373_v53 }
  0x3d   :  { %v360_v57 = vld [vmem:[#allocation2 + $0xf1] sm:$0xff]  ;;  %v361_v58 = vld [vmem:[#allocation2 + $0x101] sm:$0xff]  ;;  %v3800_v62 = vpack.i.bf16 %v4374_v55, %v362_v54 }
  0x3e   :  { %v378_v60 = vld [vmem:[#allocation2 + $0x112] sm:$0xff]  ;;  %v4378_v61 = vld [vmem:[#allocation2 + $0x122] sm:$0xff]  ;;  %v3795_v0 = vpack.i.bf16 %v361_v58, %v360_v57  ;;  %v3880_v20 = vpack.i.bf16 %v362_v54, %v361_v58  ;;  %v3875_v21 = vpack.i.bf16 %v360_v57, %v4362_v44 }
  0x3f   :  { %3771 = vrot.lane.b32.xlu1 %v3770_v41, %s4080_s0  ;;  %v376_v63 = vld [vmem:[#allocation2 + $0xf2] sm:$0xff]  ;;  %v377_v1 = vld [vmem:[#allocation2 + $0x102] sm:$0xff]  ;;  %v3810_v2 = vpack.i.bf16 %v4378_v61, %v378_v60 }
  0x40   :  { %3766 = vrot.lane.b32.xlu0 %v3765_v42, %s4080_s0  ;;  %v3805_v4 = vpack.i.bf16 %v377_v1, %v376_v63  ;;  %v153_v16 = vld [vmem:[#allocation2 + $0xa2] sm:$0xff]  ;;  %v3890_v22 = vpack.i.bf16 %v378_v60, %v377_v1  ;;  %v3885_v23 = vpack.i.bf16 %v376_v63, %v375_v51 }
  0x41   :  { %v3865_v19 = vpack.i.bf16 %v372_v52, %v153_v16 }
  0x43   :  { %3781 = vrot.lane.b32.xlu1 %v3780_v47, %s4081_s22 }
  0x44   :  { %3776 = vrot.lane.b32.xlu0 %v3775_v49, %s4081_s22 }
  0x47   :  { %3791 = vrot.lane.b32.xlu1 %v3790_v56, %s4080_s0 }
  0x48   :  { %3786 = vrot.lane.b32.xlu0 %v3785_v59, %s4080_s0 }
  0x4b   :  { %3801 = vrot.lane.b32.xlu1 %v3800_v62, %s4081_s22 }
  0x4c   :  { %3796 = vrot.lane.b32.xlu0 %v3795_v0, %s4081_s22 }
  0x4f   :  { %3811 = vrot.lane.b32.xlu1 %v3810_v2, %s4080_s0 }
  0x50   :  { %3806 = vrot.lane.b32.xlu0 %v3805_v4, %s4080_s0 }
  0x53   :  { %3821 = vrot.lane.b32.xlu1 %v3820_v5, %s4081_s22 }
  0x54   :  { %3816 = vrot.lane.b32.xlu0 %v3815_v6, %s4081_s22 }
  0x57   :  { %3831 = vrot.lane.b32.xlu1 %v3830_v8, %s4080_s0 }
  0x58   :  { %3826 = vrot.lane.b32.xlu0 %v3825_v9, %s4080_s0 }
  0x5b   :  { %3841 = vrot.lane.b32.xlu1 %v3840_v10, %s4081_s22 }
  0x5c   :  { %3836 = vrot.lane.b32.xlu0 %v3835_v11, %s4081_s22 }
  0x5f   :  { %3851 = vrot.lane.b32.xlu1 %v3850_v12, %s4080_s0 }
  0x60   :  { %3846 = vrot.lane.b32.xlu0 %v3845_v14, %s4080_s0 }
  0x63   :  { %3861 = vrot.lane.b32.xlu1 %v3860_v15, %s4081_s22 }
  0x64   :  { %3856 = vrot.lane.b32.xlu0 %v3855_v17, %s4081_s22 }
  0x67   :  { %3871 = vrot.lane.b32.xlu1 %v3870_v18, %s4080_s0 }
  0x68   :  { %3866 = vrot.lane.b32.xlu0 %v3865_v19, %s4080_s0 }
  0x6b   :  { %3881 = vrot.lane.b32.xlu1 %v3880_v20, %s4081_s22 }
  0x6c   :  { %3876 = vrot.lane.b32.xlu0 %v3875_v21, %s4081_s22 }
  0x6f   :  { %3891 = vrot.lane.b32.xlu1 %v3890_v22, %s4080_s0 }
  0x70   :  { %3886 = vrot.lane.b32.xlu0 %v3885_v23, %s4080_s0 }
  0x73   :  { %3901 = vrot.lane.b32.xlu1 %v3835_v11, %s4081_s22 }
  0x74   :  { %14 = vsyncpa [#allocation5], 0  ;;  %3896 = vrot.lane.b32.xlu0 %v3820_v5, %s4081_s22  ;;  %v835_v24 = vld [vmem:[#allocation2 + $0x91] sm:$0xff]  ;;  %v4434_v37 = vld [vmem:[#allocation2 + $0x20] sm:$0xff]  ;;  %vm305_vm3 = vcmask 64512   ;;  %vm556_vm4 = vcmask 97280  }
  0x75   :  { %v3920_v25 = vpack.i.bf16 %v835_v24, %v4352_v32  ;;  %v851_v26 = vld [vmem:[#allocation2 + $0x92] sm:$0xff]  ;;  %v4442_v46 = vld [vmem:[#allocation2 + $0x40] sm:$0xff]  ;;  %v712_v63 = vsel %vm581_vm2, %v4369_v48, 0 }
  0x76   :  { %v3930_v27 = vpack.i.bf16 %v851_v26, %v4357_v38  ;;  %v843_v28 = vld [vmem:[#allocation2 + $0x131] sm:$0xff]  ;;  %v4462_v2 = vld [vmem:[#allocation2 + $0x80] sm:$0xff] }
  0x77   :  { %3911 = vrot.lane.b32.xlu1 %v3845_v14, %s4080_s0  ;;  %v3960_v29 = vpack.i.bf16 %v843_v28, %v4374_v55  ;;  %v859_v30 = vld [vmem:[#allocation2 + $0x132] sm:$0xff]  ;;  %v4466_v6 = vld [vmem:[#allocation2 + $0x60] sm:$0xff] }
  0x78   :  { %3906 = vrot.lane.b32.xlu0 %v3830_v8, %s4080_s0  ;;  %v3970_v31 = vpack.i.bf16 %v859_v30, %v4378_v61  ;;  %v4432_v36 = vld [vmem:[#allocation2 + $0x10] sm:$0xff] }
  0x79   :  { %v4440_v45 = vld [vmem:[#allocation2 + $0x30] sm:$0xff] }
  0x7a   :  { %v4458_v0 = vld [vmem:[%s5470_s1 + $0x10] sm:$0x3f]  }
  0x7b   :  { %3921 = vrot.lane.b32.xlu1 %v3920_v25, %s4081_s22  ;;  %v4460_v1 = vld [vmem:[#allocation2 + $0x70] sm:$0xff] }
  0x7c   :  { %3916 = vrot.lane.b32.xlu0 %v3840_v10, %s4081_s22  ;;  %v4464_v5 = vld [vmem:[#allocation2 + $0x50] sm:$0xff] }
  0x7d   :  { %v4483_v26 = vld [vmem:[#allocation2 + $0xd0] sm:$0xff] }
  0x7e   :  { %v4488_v30 = vld [vmem:[#allocation2 + $0xb0] sm:$0xff] }
  0x7f   :  { %3931 = vrot.lane.b32.xlu1 %v3930_v27, %s4080_s0  ;;  %v4485_v27 = vld [vmem:[#allocation2 + $0xe0] sm:$0xff] }
  0x80   :  { %3926 = vrot.lane.b32.xlu0 %v3850_v12, %s4080_s0 }
  0x83   :  { %3941 = vrot.lane.b32.xlu1 %v3875_v21, %s4081_s22 }
  0x84   :  { %3936 = vrot.lane.b32.xlu0 %v3860_v15, %s4081_s22 }
  0x87   :  { %3951 = vrot.lane.b32.xlu1 %v3885_v23, %s4080_s0 }
  0x88   :  { %3946 = vrot.lane.b32.xlu0 %v3870_v18, %s4080_s0 }
  0x8b   :  { %3961 = vrot.lane.b32.xlu1 %v3960_v29, %s4081_s22 }
  0x8c   :  { %3956 = vrot.lane.b32.xlu0 %v3880_v20, %s4081_s22 }
  0x8f   :  { %3971 = vrot.lane.b32.xlu1 %v3970_v31, %s4080_s0  ;;  %v4490_v31 = vld [vmem:[#allocation2 + $0xc0] sm:$0xff] }
  0x90   :  { %3966 = vrot.lane.b32.xlu0 %v3890_v22, %s4080_s0 }
  0xa5   :  { %v3747_v32 = vpop.permute.xlu1 %3746 }
  0xa6   :  { %v3749_v33 = vunpack.i.h.bf16 %v3747_v32  ;;  %v3748_v34 = vunpack.i.l.bf16 %v3747_v32  ;;  %v3737_v35 = vpop.permute.xlu0 %3736 }
  0xa7   :  { %v3739_v38 = vunpack.i.h.bf16 %v3737_v35  ;;  %v3738_v39 = vunpack.i.l.bf16 %v3737_v35 }
  0xa9   :  { %v3752_v40 = vpop.permute.xlu1 %3751  ;;  %v508_v41 = vsel %vm38_vm0, %v4432_v36, %v3738_v39  ;;  %v509_v42 = vsel %vm38_vm0, %v4434_v37, %v3739_v38 }
  0xaa   :  { %v3754_v43 = vunpack.i.h.bf16 %v3752_v40  ;;  %v3753_v44 = vunpack.i.l.bf16 %v3752_v40  ;;  %v3742_v47 = vpop.permute.xlu0 %3741  ;;  %v524_v49 = vsel %vm305_vm3, %v508_v41, %v3748_v34  ;;  %v525_v50 = vsel %vm305_vm3, %v509_v42, %v3749_v33 }
  0xab   :  { %v3744_v51 = vunpack.i.h.bf16 %v3742_v47  ;;  %v3743_v52 = vunpack.i.l.bf16 %v3742_v47  ;;  %v540_v53 = vpack.c.bf16 %v525_v50, %v524_v49 }
  0xad   :  { %v511_v54 = vsel %vm38_vm0, %v4442_v46, %v3744_v51  ;;  %v510_v55 = vsel %vm38_vm0, %v4440_v45, %v3743_v52  ;;  %3435 = vmatprep.mubr.msk.bf16.mxu0 %vm556_vm4, %v540_v53  ;;  %v3762_v56 = vpop.permute.xlu1 %3761 }
  0xae   :  { %v3757_v57 = vpop.permute.xlu0 %3756  ;;  %v526_v58 = vsel %vm305_vm3, %v510_v55, %v3753_v44  ;;  %v527_v59 = vsel %vm305_vm3, %v511_v54, %v3754_v43  ;;  %v3764_v60 = vunpack.i.h.bf16 %v3762_v56  ;;  %v3763_v61 = vunpack.i.l.bf16 %v3762_v56 }
  0xaf   :  { %v541_v62 = vpack.c.bf16 %v527_v59, %v526_v58  ;;  %v3759_v3 = vunpack.i.h.bf16 %v3757_v57  ;;  %v3758_v4 = vunpack.i.l.bf16 %v3757_v57  ;;  %v4505_v57 = vld [vmem:[#allocation2 + $0x110] sm:$0xff]  ;;  %v4507_v58 = vld [vmem:[#allocation2 + $0x120] sm:$0xff] }
  0xb0   :  { %v515_v10 = vsel %vm38_vm0, %v4462_v2, %v3764_v60  ;;  %v514_v11 = vsel %vm38_vm0, %v4460_v1, %v3763_v61  ;;  %v4510_v61 = vld [vmem:[#allocation2 + $0xf0] sm:$0xff] }
  0xb1   :  { %3436 = vmatmul.mubr.msk.bf16.vlgmr.msra.gmra.mrb[0].mxu0 %vm556_vm4, %v541_v62  ;;  %v3772_v7 = vpop.permute.xlu1 %3771  ;;  %v513_v14 = vsel %vm38_vm0, %v4466_v6, %v3759_v3  ;;  %v512_v15 = vsel %vm38_vm0, %v4464_v5, %v3758_v4  ;;  %v4512_v62 = vld [vmem:[#allocation2 + $0x100] sm:$0xff] }
  0xb2   :  { %3452 = vmatpush3.bf16.msra.mxu0 %v712_v63  ;;  %v3774_v48 = vunpack.i.h.bf16 %v3772_v7  ;;  %v3773_v8 = vunpack.i.l.bf16 %v3772_v7  ;;  %v3767_v9 = vpop.permute.xlu0 %3766 }
  0xb3   :  { %v3769_v12 = vunpack.i.h.bf16 %v3767_v9  ;;  %v3768_v13 = vunpack.i.l.bf16 %v3767_v9  ;;  %3729 = vmatprep.subr.msk.bf16.mxu0 %vm581_vm2, %v4458_v0 }
  0xb4   :  { %v530_v16 = vsel %vm305_vm3, %v514_v11, %v3773_v8  ;;  %v531_v17 = vsel %vm305_vm3, %v515_v10, %v3774_v48 }
  0xb5   :  { %v543_v18 = vpack.c.bf16 %v531_v17, %v530_v16  ;;  %v528_v19 = vsel %vm305_vm3, %v512_v15, %v3768_v13  ;;  %v529_v20 = vsel %vm305_vm3, %v513_v14, %v3769_v12  ;;  %v3782_v21 = vpop.permute.xlu1 %3781 }
  0xb6   :  { %v542_v22 = vpack.c.bf16 %v529_v20, %v528_v19  ;;  %v3777_v23 = vpop.permute.xlu0 %3776  ;;  %v3784_v24 = vunpack.i.h.bf16 %v3782_v21  ;;  %v3783_v25 = vunpack.i.l.bf16 %v3782_v21 }
  0xb7   :  { %v3779_v28 = vunpack.i.h.bf16 %v3777_v23  ;;  %v3778_v29 = vunpack.i.l.bf16 %v3777_v23 }
  0xb8   :  { %3439 = vmatprep.mubr.msk.bf16.mxu0 %vm556_vm4, %v542_v22  ;;  %v519_v38 = vsel %vm38_vm0, %v4485_v27, %v3784_v24  ;;  %v518_v39 = vsel %vm38_vm0, %v4483_v26, %v3783_v25  ;;  %v113_v25 = vld [vmem:[#allocation2] sm:$0xff] }
  0xb9   :  { %3440 = vmatmul.mubr.msk.bf16.gmra.mrb[4].mxu0 %vm556_vm4, %v543_v18  ;;  %v3792_v32 = vpop.permute.xlu1 %3791  ;;  %v517_v42 = vsel %vm38_vm0, %v4490_v31, %v3779_v28  ;;  %v516_v43 = vsel %vm38_vm0, %v4488_v30, %v3778_v29 }
  0xba   :  { %v3794_v33 = vunpack.i.h.bf16 %v3792_v32  ;;  %v3793_v34 = vunpack.i.l.bf16 %v3792_v32  ;;  %v3787_v35 = vpop.permute.xlu0 %3786 }
  0xbb   :  { %v3789_v40 = vunpack.i.h.bf16 %v3787_v35  ;;  %v3788_v41 = vunpack.i.l.bf16 %v3787_v35 }
  0xbc   :  { %v534_v44 = vsel %vm305_vm3, %v518_v39, %v3793_v34  ;;  %v535_v47 = vsel %vm305_vm3, %v519_v38, %v3794_v33 }
  0xbd   :  { %v545_v49 = vpack.c.bf16 %v535_v47, %v534_v44  ;;  %v532_v50 = vsel %vm305_vm3, %v516_v43, %v3788_v41  ;;  %v533_v51 = vsel %vm305_vm3, %v517_v42, %v3789_v40  ;;  %v3802_v52 = vpop.permute.xlu1 %3801 }
  0xbe   :  { %v544_v53 = vpack.c.bf16 %v533_v51, %v532_v50  ;;  %v3797_v54 = vpop.permute.xlu0 %3796  ;;  %v3804_v55 = vunpack.i.h.bf16 %v3802_v52  ;;  %v3803_v56 = vunpack.i.l.bf16 %v3802_v52 }
  0xbf   :  { %v3799_v59 = vunpack.i.h.bf16 %v3797_v54  ;;  %v3798_v60 = vunpack.i.l.bf16 %v3797_v54 }
  0xc0   :  { %3443 = vmatprep.mubr.msk.bf16.mxu0 %vm556_vm4, %v544_v53  ;;  %v523_v48 = vsel %vm38_vm0, %v4507_v58, %v3804_v55  ;;  %v522_v8 = vsel %vm38_vm0, %v4505_v57, %v3803_v56  ;;  %v1061_v55 = vsel %vm581_vm2, %v4458_v0, 0 }
  0xc1   :  { %3444 = vmatmul.mubr.msk.bf16.gmra.mrb[8].mxu0 %vm556_vm4, %v545_v49  ;;  %v3812_v63 = vpop.permute.xlu1 %3811  ;;  %v521_v11 = vsel %vm38_vm0, %v4512_v62, %v3799_v59  ;;  %v520_v12 = vsel %vm38_vm0, %v4510_v61, %v3798_v60 }
  0xc2   :  { %v3814_v3 = vunpack.i.h.bf16 %v3812_v63  ;;  %v3813_v4 = vunpack.i.l.bf16 %v3812_v63  ;;  %v3807_v7 = vpop.permute.xlu0 %3806 }
  0xc3   :  { %v3809_v9 = vunpack.i.h.bf16 %v3807_v7  ;;  %v3808_v10 = vunpack.i.l.bf16 %v3807_v7 }
  0xc4   :  { %v538_v13 = vsel %vm305_vm3, %v522_v8, %v3813_v4  ;;  %v539_v14 = vsel %vm305_vm3, %v523_v48, %v3814_v3 }
  0xc5   :  { %v547_v15 = vpack.c.bf16 %v539_v14, %v538_v13  ;;  %v536_v16 = vsel %vm305_vm3, %v520_v12, %v3808_v10  ;;  %v537_v17 = vsel %vm305_vm3, %v521_v11, %v3809_v9  ;;  %v3822_v18 = vpop.permute.xlu1 %3821 }
  0xc6   :  { %v546_v19 = vpack.c.bf16 %v537_v17, %v536_v16  ;;  %v3817_v20 = vpop.permute.xlu0 %3816  ;;  %v3824_v21 = vunpack.i.h.bf16 %v3822_v18  ;;  %v3823_v22 = vunpack.i.l.bf16 %v3822_v18 }
  0xc7   :  { %v3819_v23 = vunpack.i.h.bf16 %v3817_v20  ;;  %v3818_v24 = vunpack.i.l.bf16 %v3817_v20 }
  0xc8   :  { %3447 = vmatprep.mubr.msk.bf16.mxu0 %vm556_vm4, %v546_v19  ;;  %v292_v34 = vsel %vm38_vm0, %v4440_v45, %v3824_v21  ;;  %v291_v35 = vsel %vm38_vm0, %v4434_v37, %v3823_v22  ;;  %v121_v22 = vld [vmem:[#allocation2 + $0xa0] sm:$0xff] }
  0xc9   :  { %3448 = vmatmul.mubr.msk.bf16.gmra.mrb[12].mxu0 %vm556_vm4, %v547_v15  ;;  %v3832_v28 = vpop.permute.xlu1 %3831  ;;  %v290_v40 = vsel %vm38_vm0, %v4432_v36, %v3819_v23  ;;  %v289_v41 = vsel %vm38_vm0, %v113_v25, %v3818_v24 }
  0xca   :  { %v3834_v29 = vunpack.i.h.bf16 %v3832_v28  ;;  %v3833_v32 = vunpack.i.l.bf16 %v3832_v28  ;;  %v3827_v33 = vpop.permute.xlu0 %3826 }
  0xcb   :  { %v3829_v38 = vunpack.i.h.bf16 %v3827_v33  ;;  %v3828_v39 = vunpack.i.l.bf16 %v3827_v33 }
  0xcc   :  { %v308_v42 = vsel %vm305_vm3, %v291_v35, %v3833_v32  ;;  %v309_v43 = vsel %vm305_vm3, %v292_v34, %v3834_v29 }
  0xcd   :  { %v323_v44 = vpack.c.bf16 %v309_v43, %v308_v42  ;;  %v306_v47 = vsel %vm305_vm3, %v289_v41, %v3828_v39  ;;  %v307_v49 = vsel %vm305_vm3, %v290_v40, %v3829_v38  ;;  %v3842_v50 = vpop.permute.xlu1 %3841 }
  0xce   :  { %v322_v51 = vpack.c.bf16 %v307_v49, %v306_v47  ;;  %v3837_v52 = vpop.permute.xlu0 %3836  ;;  %v3844_v53 = vunpack.i.h.bf16 %v3842_v50  ;;  %v3843_v54 = vunpack.i.l.bf16 %v3842_v50 }
  0xcf   :  { %v3839_v36 = vunpack.i.h.bf16 %v3837_v52  ;;  %v3838_v56 = vunpack.i.l.bf16 %v3837_v52 }
  0xd0   :  { %3453 = vmatprep.mubr.msk.bf16.mxu0 %vm556_vm4, %v322_v51  ;;  %v296_v4 = vsel %vm38_vm0, %v4460_v1, %v3844_v53  ;;  %v295_v7 = vsel %vm38_vm0, %v4466_v6, %v3843_v54 }
  0xd1   :  { %3454 = vmatmul.mubr.msk.bf16.vlgmr.msra.gmra.mrb[0].mxu0 %vm556_vm4, %v323_v44  ;;  %v3852_v59 = vpop.permute.xlu1 %3851  ;;  %v294_v0 = vsel %vm38_vm0, %v4464_v5, %v3839_v36  ;;  %v293_v9 = vsel %vm38_vm0, %v4442_v46, %v3838_v56 }
  0xd2   :  { %3470 = vmatpush3.bf16.msra.mxu0 %v1061_v55  ;;  %v3854_v60 = vunpack.i.h.bf16 %v3852_v59  ;;  %v3853_v63 = vunpack.i.l.bf16 %v3852_v59  ;;  %v3847_v3 = vpop.permute.xlu0 %3846 }
  0xd3   :  { %v3849_v48 = vunpack.i.h.bf16 %v3847_v3  ;;  %v3848_v8 = vunpack.i.l.bf16 %v3847_v3 }
  0xd4   :  { %v312_v10 = vsel %vm305_vm3, %v295_v7, %v3853_v63  ;;  %v313_v11 = vsel %vm305_vm3, %v296_v4, %v3854_v60 }
  0xd5   :  { %v325_v12 = vpack.c.bf16 %v313_v11, %v312_v10  ;;  %v310_v13 = vsel %vm305_vm3, %v293_v9, %v3848_v8  ;;  %v311_v14 = vsel %vm305_vm3, %v294_v0, %v3849_v48  ;;  %v3862_v15 = vpop.permute.xlu1 %3861 }
  0xd6   :  { %v324_v16 = vpack.c.bf16 %v311_v14, %v310_v13  ;;  %v3857_v17 = vpop.permute.xlu0 %3856  ;;  %v3864_v18 = vunpack.i.h.bf16 %v3862_v15  ;;  %v3863_v19 = vunpack.i.l.bf16 %v3862_v15 }
  0xd7   :  { %v3859_v20 = vunpack.i.h.bf16 %v3857_v17  ;;  %v3858_v21 = vunpack.i.l.bf16 %v3857_v17 }
  0xd8   :  { %3457 = vmatprep.mubr.msk.bf16.mxu0 %vm556_vm4, %v324_v16  ;;  %v300_v29 = vsel %vm38_vm0, %v4483_v26, %v3864_v18  ;;  %v299_v32 = vsel %vm38_vm0, %v4490_v31, %v3863_v19 }
  0xd9   :  { %3458 = vmatmul.mubr.msk.bf16.gmra.mrb[4].mxu0 %vm556_vm4, %v325_v12  ;;  %v3872_v23 = vpop.permute.xlu1 %3871  ;;  %v298_v35 = vsel %vm38_vm0, %v4488_v30, %v3859_v20  ;;  %v297_v38 = vsel %vm38_vm0, %v121_v22, %v3858_v21 }
  0xda   :  { %v3874_v24 = vunpack.i.h.bf16 %v3872_v23  ;;  %v3873_v25 = vunpack.i.l.bf16 %v3872_v23  ;;  %v3867_v28 = vpop.permute.xlu0 %3866 }
  0xdb   :  { %v3869_v33 = vunpack.i.h.bf16 %v3867_v28  ;;  %v3868_v34 = vunpack.i.l.bf16 %v3867_v28 }
  0xdc   :  { %v316_v39 = vsel %vm305_vm3, %v299_v32, %v3873_v25  ;;  %v317_v40 = vsel %vm305_vm3, %v300_v29, %v3874_v24 }
  0xdd   :  { %v327_v41 = vpack.c.bf16 %v317_v40, %v316_v39  ;;  %v314_v42 = vsel %vm305_vm3, %v297_v38, %v3868_v34  ;;  %v315_v43 = vsel %vm305_vm3, %v298_v35, %v3869_v33  ;;  %v3882_v44 = vpop.permute.xlu1 %3881 }
  0xde   :  { %v326_v47 = vpack.c.bf16 %v315_v43, %v314_v42  ;;  %v3877_v49 = vpop.permute.xlu0 %3876  ;;  %v3884_v50 = vunpack.i.h.bf16 %v3882_v44  ;;  %v3883_v51 = vunpack.i.l.bf16 %v3882_v44 }
  0xdf   :  { %v3879_v52 = vunpack.i.h.bf16 %v3877_v49  ;;  %v3878_v53 = vunpack.i.l.bf16 %v3877_v49 }
  0xe0   :  { %3461 = vmatprep.mubr.msk.bf16.mxu0 %vm556_vm4, %v326_v47  ;;  %v304_v56 = vsel %vm38_vm0, %v4505_v57, %v3884_v50  ;;  %v303_v59 = vsel %vm38_vm0, %v4512_v62, %v3883_v51 }
  0xe1   :  { %3462 = vmatmul.mubr.msk.bf16.gmra.mrb[8].mxu0 %vm556_vm4, %v327_v41  ;;  %v3892_v30 = vpop.permute.xlu1 %3891  ;;  %v302_v3 = vsel %vm38_vm0, %v4510_v61, %v3879_v52  ;;  %v301_v4 = vsel %vm38_vm0, %v4485_v27, %v3878_v53  ;;  %v819_v41 = vld [vmem:[#allocation2 + $0x90] sm:$0xff] }
  0xe2   :  { %v3894_v54 = vunpack.i.h.bf16 %v3892_v30  ;;  %v3893_v55 = vunpack.i.l.bf16 %v3892_v30  ;;  %v3887_v36 = vpop.permute.xlu0 %3886 }
  0xe3   :  { %v3889_v60 = vunpack.i.h.bf16 %v3887_v36  ;;  %v3888_v63 = vunpack.i.l.bf16 %v3887_v36 }
  0xe4   :  { %v320_v7 = vsel %vm305_vm3, %v303_v59, %v3893_v55  ;;  %v321_v48 = vsel %vm305_vm3, %v304_v56, %v3894_v54 }
  0xe5   :  { %v329_v8 = vpack.c.bf16 %v321_v48, %v320_v7  ;;  %v318_v0 = vsel %vm305_vm3, %v301_v4, %v3888_v63  ;;  %v319_v9 = vsel %vm305_vm3, %v302_v3, %v3889_v60  ;;  %v3902_v10 = vpop.permute.xlu1 %3901 }
  0xe6   :  { %v328_v11 = vpack.c.bf16 %v319_v9, %v318_v0  ;;  %v3897_v12 = vpop.permute.xlu0 %3896  ;;  %v3904_v13 = vunpack.i.h.bf16 %v3902_v10  ;;  %v3903_v14 = vunpack.i.l.bf16 %v3902_v10 }
  0xe7   :  { %v3899_v15 = vunpack.i.h.bf16 %v3897_v12  ;;  %v3898_v16 = vunpack.i.l.bf16 %v3897_v12 }
  0xe8   :  { %3465 = vmatprep.mubr.msk.bf16.mxu0 %vm556_vm4, %v328_v11  ;;  %v991_v21 = vsel %vm38_vm0, %v4464_v5, %v3904_v13  ;;  %v990_v22 = vsel %vm38_vm0, %v4442_v46, %v3903_v14 }
  0xe9   :  { %3466 = vmatmul.mubr.msk.bf16.gmra.mrb[12].mxu0 %vm556_vm4, %v329_v8  ;;  %v3912_v17 = vpop.permute.xlu1 %3911  ;;  %v989_v25 = vsel %vm38_vm0, %v4440_v45, %v3899_v15  ;;  %v988_v28 = vsel %vm38_vm0, %v4434_v37, %v3898_v16 }
  0xea   :  { %v3914_v18 = vunpack.i.h.bf16 %v3912_v17  ;;  %v3913_v19 = vunpack.i.l.bf16 %v3912_v17  ;;  %v3907_v20 = vpop.permute.xlu0 %3906 }
  0xeb   :  { %v3909_v23 = vunpack.i.h.bf16 %v3907_v20  ;;  %v3908_v24 = vunpack.i.l.bf16 %v3907_v20 }
  0xec   :  { %v1006_v29 = vsel %vm305_vm3, %v990_v22, %v3913_v19  ;;  %v1007_v32 = vsel %vm305_vm3, %v991_v21, %v3914_v18 }
  0xed   :  { %v1021_v33 = vpack.c.bf16 %v1007_v32, %v1006_v29  ;;  %v1004_v34 = vsel %vm305_vm3, %v988_v28, %v3908_v24  ;;  %v1005_v5 = vsel %vm305_vm3, %v989_v25, %v3909_v23  ;;  %v3922_v35 = vpop.permute.xlu1 %3921  ;;  %v827_v23 = vld [vmem:[#allocation2 + $0x130] sm:$0xff] }
  0xee   :  { %v1020_v38 = vpack.c.bf16 %v1005_v5, %v1004_v34  ;;  %v3917_v46 = vpop.permute.xlu0 %3916  ;;  %v3924_v39 = vunpack.i.h.bf16 %v3922_v35  ;;  %v3923_v40 = vunpack.i.l.bf16 %v3922_v35 }
  0xef   :  { %v3919_v42 = vunpack.i.h.bf16 %v3917_v46  ;;  %v3918_v45 = vunpack.i.l.bf16 %v3917_v46 }
  0xf0   :  { %3471 = vmatprep.mubr.msk.bf16.mxu0 %vm556_vm4, %v1020_v38  ;;  %v995_v49 = vsel %vm38_vm0, %v819_v41, %v3924_v39  ;;  %v994_v50 = vsel %vm38_vm0, %v4462_v2, %v3923_v40 }
  0xf1   :  { %3472 = vmatmul.mubr.msk.bf16.vlgmr.msra.gmra.mrb[0].mxu0 %vm556_vm4, %v1021_v33  ;;  %v3932_v37 = vpop.permute.xlu1 %3931  ;;  %v993_v53 = vsel %vm38_vm0, %v4460_v1, %v3919_v42  ;;  %v992_v30 = vsel %vm38_vm0, %v4466_v6, %v3918_v45 }
  0xf2   :  { %v3934_v43 = vunpack.i.h.bf16 %v3932_v37  ;;  %v3933_v44 = vunpack.i.l.bf16 %v3932_v37  ;;  %v3927_v47 = vpop.permute.xlu0 %3926  ;;  %v3981_v37 = vld [vmem:[%s5474_s5 + $0xc8] sm:$0xff]  }
  0xf3   :  { %v3929_v51 = vunpack.i.h.bf16 %v3927_v47  ;;  %v3928_v52 = vunpack.i.l.bf16 %v3927_v47  ;;  %v3984_v47 = vld [vmem:[%s5474_s5 + $0x118] sm:$0xff]  }
  0xf4   :  { %v1010_v54 = vsel %vm305_vm3, %v994_v50, %v3933_v44  ;;  %v1011_v55 = vsel %vm305_vm3, %v995_v49, %v3934_v43  ;;  %v3982_v43 = vld [vmem:[%s5474_s5 + $0x110] sm:$0xff]   ;;  %v3985_v49 = vld [vmem:[%s5474_s5 + $0xd8] sm:$0xff]   ;;  %v3986_v50 = vld [vmem:[%s5474_s5 + $0x120] sm:$0xff]  }
  0xf5   :  { %v1023_v36 = vpack.c.bf16 %v1011_v55, %v1010_v54  ;;  %v1008_v56 = vsel %vm305_vm3, %v992_v30, %v3928_v52  ;;  %v1009_v59 = vsel %vm305_vm3, %v993_v53, %v3929_v51  ;;  %v3942_v60 = vpop.permute.xlu1 %3941  ;;  %v3983_v44 = vld [vmem:[%s5474_s5 + $0xd0] sm:$0xff]   ;;  %v3987_v51 = vld [vmem:[%s5474_s5 + $0xe0] sm:$0xff]   ;;  %v3988_v52 = vld [vmem:[%s5474_s5 + $0x128] sm:$0xff]  }
  0xf6   :  { %v1022_v63 = vpack.c.bf16 %v1009_v59, %v1008_v56  ;;  %v3937_v2 = vpop.permute.xlu0 %3936  ;;  %v3944_v3 = vunpack.i.h.bf16 %v3942_v60  ;;  %v3943_v4 = vunpack.i.l.bf16 %v3942_v60  ;;  %v3989_v53 = vld [vmem:[%s5474_s5 + $0xe8] sm:$0xff]   ;;  %v3990_v30 = vld [vmem:[%s5474_s5 + $0x130] sm:$0xff]   ;;  %v3992_v55 = vld [vmem:[%s5474_s5 + $0x138] sm:$0xff]  }
  0xf7   :  { %v3939_v7 = vunpack.i.h.bf16 %v3937_v2  ;;  %v3938_v48 = vunpack.i.l.bf16 %v3937_v2  ;;  %v3991_v54 = vld [vmem:[%s5474_s5 + $0xf0] sm:$0xff]   ;;  %v4690_v56 = vld [vmem:[%s5474_s5 + $0x140] sm:$0xff]  }
  0xf8   :  { %3475 = vmatprep.mubr.msk.bf16.mxu0 %vm556_vm4, %v1022_v63  ;;  %v999_v9 = vsel %vm38_vm0, %v4510_v61, %v3944_v3  ;;  %v998_v10 = vsel %vm38_vm0, %v4485_v27, %v3943_v4  ;;  %v3995_v59 = vld [vmem:[%s5474_s5 + $0x40] sm:$0xff]  }
  0xf9   :  { %3476 = vmatmul.mubr.msk.bf16.gmra.mrb[4].mxu0 %vm556_vm4, %v1023_v36  ;;  %v3952_v1 = vpop.permute.xlu1 %3951  ;;  %v997_v13 = vsel %vm38_vm0, %v4483_v26, %v3939_v7  ;;  %v996_v14 = vsel %vm38_vm0, %v4490_v31, %v3938_v48  ;;  %v3993_v36 = vld [vmem:[%s5474_s5 + $0xf8] sm:$0xff]   ;;  %v4699_v60 = vld [vmem:[%s5471_s2] ss:$0 sm:$0xff] }
  0xfa   :  { %v3954_v6 = vunpack.i.h.bf16 %v3952_v1  ;;  %v3953_v8 = vunpack.i.l.bf16 %v3952_v1  ;;  %v3947_v0 = vpop.permute.xlu0 %3946 }
  0xfb   :  { %v3949_v11 = vunpack.i.h.bf16 %v3947_v0  ;;  %v3948_v12 = vunpack.i.l.bf16 %v3947_v0 }
  0xfc   :  { %v1014_v15 = vsel %vm305_vm3, %v998_v10, %v3953_v8  ;;  %v1015_v16 = vsel %vm305_vm3, %v999_v9, %v3954_v6 }
  0xfd   :  { %v1025_v17 = vpack.c.bf16 %v1015_v16, %v1014_v15  ;;  %v1012_v18 = vsel %vm305_vm3, %v996_v14, %v3948_v12  ;;  %v1013_v61 = vsel %vm305_vm3, %v997_v13, %v3949_v11  ;;  %v3962_v19 = vpop.permute.xlu1 %3961 }
  0xfe   :  { %v1024_v20 = vpack.c.bf16 %v1013_v61, %v1012_v18  ;;  %v3957_v27 = vpop.permute.xlu0 %3956  ;;  %v3964_v21 = vunpack.i.h.bf16 %v3962_v19  ;;  %v3963_v22 = vunpack.i.l.bf16 %v3962_v19 }
  0xff   :  { %v3959_v24 = vunpack.i.h.bf16 %v3957_v27  ;;  %v3958_v26 = vunpack.i.l.bf16 %v3957_v27 }
 0x100   :  { %3479 = vmatprep.mubr.msk.bf16.mxu0 %vm556_vm4, %v1024_v20  ;;  %v1003_v32 = vsel %vm38_vm0, %v827_v23, %v3964_v21  ;;  %v1002_v33 = vsel %vm38_vm0, %v4507_v58, %v3963_v22  ;;  %v3979_v58 = vld [vmem:[%s5474_s5 + $0xc0] sm:$0xff]  }
 0x101   :  { %3480 = vmatmul.mubr.msk.bf16.gmra.mrb[8].mxu0 %vm556_vm4, %v1025_v17  ;;  %v3972_v31 = vpop.permute.xlu1 %3971  ;;  %v1001_v35 = vsel %vm38_vm0, %v4505_v57, %v3959_v24  ;;  %v1000_v38 = vsel %vm38_vm0, %v4512_v62, %v3958_v26  ;;  %v3978_v57 = vld [vmem:[%s5474_s5 + $0x100] sm:$0xff]   ;;  %v3980_v62 = vld [vmem:[%s5474_s5 + $0x108] sm:$0xff]  }
 0x102   :  { %v3974_v25 = vunpack.i.h.bf16 %v3972_v31  ;;  %v3973_v28 = vunpack.i.l.bf16 %v3972_v31  ;;  %v3967_v29 = vpop.permute.xlu0 %3966  ;;  %3583 = vmatprep.subr.bf16.mxu1 %v3978_v57  ;;  %3193 = vmatprep.subr.bf16.mxu0 %v3978_v57 }
 0x103   :  { %v3969_v34 = vunpack.i.h.bf16 %v3967_v29  ;;  %v3968_v5 = vunpack.i.l.bf16 %v3967_v29  ;;  %3591 = vmatpush3.bf16.msra.mxu1 %v3979_v58  ;;  %3194 = vmatpush3.bf16.msra.mxu0 %v3979_v58 }
 0x104   :  { %v1018_v46 = vsel %vm305_vm3, %v1002_v33, %v3973_v28  ;;  %v1019_v39 = vsel %vm305_vm3, %v1003_v32, %v3974_v25  ;;  %3584 = vmatprep.subr.bf16.mxu1 %v3980_v62  ;;  %3195 = vmatprep.subr.bf16.mxu0 %v3980_v62 }
 0x105   :  { %v1027_v40 = vpack.c.bf16 %v1019_v39, %v1018_v46  ;;  %v1016_v41 = vsel %vm305_vm3, %v1000_v38, %v3968_v5  ;;  %v1017_v42 = vsel %vm305_vm3, %v1001_v35, %v3969_v34 }
 0x106   :  { %v1026_v45 = vpack.c.bf16 %v1017_v42, %v1016_v41 }
 0x107   :  { %3592 = vmatpush3.bf16.msra.mxu1 %v3981_v37  ;;  %3196 = vmatpush3.bf16.msra.mxu0 %v3981_v37 }
 0x108   :  { %3483 = vmatprep.mubr.msk.bf16.mxu0 %vm556_vm4, %v1026_v45  ;;  %3585 = vmatprep.subr.bf16.mxu1 %v3982_v43 }
 0x109   :  { %3484 = vmatmul.mubr.msk.bf16.gmra.mrb[12].mxu0 %vm556_vm4, %v1027_v40  ;;  %3197 = vmatprep.subr.bf16.mxu0 %v3982_v43 }
 0x10b   :  { %3593 = vmatpush3.bf16.msra.mxu1 %v3983_v44  ;;  %3198 = vmatpush3.bf16.msra.mxu0 %v3983_v44 }
 0x10c   :  { %3586 = vmatprep.subr.bf16.mxu1 %v3984_v47  ;;  %3199 = vmatprep.subr.bf16.mxu0 %v3984_v47 }
 0x10f   :  { %3594 = vmatpush3.bf16.msra.mxu1 %v3985_v49  ;;  %3200 = vmatpush3.bf16.msra.mxu0 %v3985_v49 }
 0x110   :  { %3587 = vmatprep.subr.bf16.mxu1 %v3986_v50  ;;  %3201 = vmatprep.subr.bf16.mxu0 %v3986_v50 }
 0x113   :  { %3595 = vmatpush3.bf16.msra.mxu1 %v3987_v51  ;;  %3202 = vmatpush3.bf16.msra.mxu0 %v3987_v51 }
 0x114   :  { %3588 = vmatprep.subr.bf16.mxu1 %v3988_v52  ;;  %3203 = vmatprep.subr.bf16.mxu0 %v3988_v52 }
 0x117   :  { %3596 = vmatpush3.bf16.msra.mxu1 %v3989_v53  ;;  %3204 = vmatpush3.bf16.msra.mxu0 %v3989_v53 }
 0x118   :  { %3589 = vmatprep.subr.bf16.mxu1 %v3990_v30  ;;  %3205 = vmatprep.subr.bf16.mxu0 %v3990_v30 }
 0x11b   :  { %3597 = vmatpush3.bf16.msra.mxu1 %v3991_v54  ;;  %3206 = vmatpush3.bf16.msra.mxu0 %v3991_v54 }
 0x11c   :  { %3590 = vmatprep.subr.bf16.mxu1 %v3992_v55  ;;  %3207 = vmatprep.subr.bf16.mxu0 %v3992_v55 }
 0x11f   :  { %3598 = vmatpush3.bf16.msra.mxu1 %v3993_v36  ;;  %3208 = vmatpush3.bf16.msra.mxu0 %v3993_v36 }
 0x120   :  { %3487 = vmatprep.subr.bf16.mxu1 %v4690_v56  ;;  %3273 = vmatprep.subr.bf16.mxu0 %v3995_v59 }
 0x1c4   :  { %v3473_v63 = vpop.f32.mrb[0].mxu0 }
 0x1c5   :  { %v1097_v2 = vpop.f32.mrb[1].mxu0  ;;  %v4705_v48 = vadd.f32 %v3473_v63, %v4699_v60 }
 0x1c6   :  { %v4702_v3 = vadd.f32 %v4699_v60, %v1097_v2  ;;  %v3474_v4 = vpop.f32.mrb[2].mxu0 }
 0x1c7   :  { %v1100_v7 = vpop.f32.mrb[3].mxu0  ;;  %v4713_v8 = vadd.f32 %v3474_v4, %v4699_v60  ;;  %v1225_v10 = vmul.f32 %v4705_v48, %v4705_v48 }
 0x1c8   :  { %v4708_v1 = vadd.f32 %v4699_v60, %v1100_v7  ;;  %v1223_v6 = vmul.f32 %v4702_v3, %v4702_v3 }
 0x1c9   :  { %v1226_v15 = vmul.f32 %v4713_v8, %v4713_v8 }
 0x1ca   :  { %v1201_v0 = vadd.f32 %v4708_v1, %v4702_v3  ;;  %v1224_v9 = vmul.f32 %v4708_v1, %v4708_v1 }
 0x1cc   :  { %v1202_v11 = vadd.f32 %v1201_v0, %v4705_v48  ;;  %v1239_v12 = vadd.f32 %v1224_v9, %v1223_v6  ;;  %v3477_v13 = vpop.f32.mrb[4].mxu0 }
 0x1cd   :  { %v1113_v14 = vpop.f32.mrb[5].mxu0  ;;  %v4729_v19 = vadd.f32 %v3477_v13, %v4699_v60 }
 0x1ce   :  { %v1240_v16 = vadd.f32 %v1239_v12, %v1225_v10  ;;  %v4725_v17 = vadd.f32 %v4699_v60, %v1113_v14  ;;  %v1203_v18 = vadd.f32 %v1202_v11, %v4713_v8  ;;  %v3478_v61 = vpop.f32.mrb[6].mxu0 }
 0x1cf   :  { %v1116_v20 = vpop.f32.mrb[7].mxu0  ;;  %v4738_v26 = vadd.f32 %v3478_v61, %v4699_v60  ;;  %v1229_v28 = vmul.f32 %v4729_v19, %v4729_v19 }
 0x1d0   :  { %v1204_v27 = vadd.f32 %v1203_v18, %v4725_v17  ;;  %v1227_v21 = vmul.f32 %v4725_v17, %v4725_v17  ;;  %v1241_v22 = vadd.f32 %v1240_v16, %v1226_v15  ;;  %v4735_v23 = vadd.f32 %v4699_v60, %v1116_v20 }
 0x1d1   :  { %v1230_v5 = vmul.f32 %v4738_v26, %v4738_v26 }
 0x1d2   :  { %v1242_v24 = vadd.f32 %v1241_v22, %v1227_v21  ;;  %v1205_v31 = vadd.f32 %v1204_v27, %v4735_v23  ;;  %v1228_v25 = vmul.f32 %v4735_v23, %v4735_v23 }
 0x1d4   :  { %v1206_v29 = vadd.f32 %v1205_v31, %v4729_v19  ;;  %v1243_v32 = vadd.f32 %v1242_v24, %v1228_v25  ;;  %v3481_v33 = vpop.f32.mrb[8].mxu0 }
 0x1d5   :  { %v1129_v34 = vpop.f32.mrb[9].mxu0  ;;  %v4753_v40 = vadd.f32 %v3481_v33, %v4699_v60 }
 0x1d6   :  { %v1244_v35 = vadd.f32 %v1243_v32, %v1229_v28  ;;  %v4749_v38 = vadd.f32 %v4699_v60, %v1129_v34  ;;  %v1207_v46 = vadd.f32 %v1206_v29, %v4738_v26  ;;  %v3482_v39 = vpop.f32.mrb[10].mxu0 }
 0x1d7   :  { %v1132_v41 = vpop.f32.mrb[11].mxu0  ;;  %v4762_v37 = vadd.f32 %v3482_v39, %v4699_v60  ;;  %v1233_v47 = vmul.f32 %v4753_v40, %v4753_v40 }
 0x1d8   :  { %v1208_v42 = vadd.f32 %v1207_v46, %v4749_v38  ;;  %v1231_v45 = vmul.f32 %v4749_v38, %v4749_v38  ;;  %v1245_v57 = vadd.f32 %v1244_v35, %v1230_v5  ;;  %v4759_v58 = vadd.f32 %v4699_v60, %v1132_v41 }
 0x1d9   :  { %v1234_v53 = vmul.f32 %v4762_v37, %v4762_v37 }
 0x1da   :  { %v1246_v62 = vadd.f32 %v1245_v57, %v1231_v45  ;;  %v1209_v43 = vadd.f32 %v1208_v42, %v4759_v58  ;;  %v1232_v44 = vmul.f32 %v4759_v58, %v4759_v58  ;;  %v1270_v42 = vlaneseq  ;;  %v1199_v57 = vld [vmem:[%s5472_s3] sm:$0x1] }
 0x1dc   :  { %v1210_v49 = vadd.f32 %v1209_v43, %v4753_v40  ;;  %v1247_v50 = vadd.f32 %v1246_v62, %v1232_v44  ;;  %v3485_v51 = vpop.f32.mrb[12].mxu0  ;;  %v1271_v45 = vshrl.u32 %v1270_v42, 7 }
 0x1dd   :  { %v1145_v52 = vpop.f32.mrb[13].mxu0  ;;  %v4775_v59 = vadd.f32 %v3485_v51, %v4699_v60 }
 0x1de   :  { %v1248_v30 = vadd.f32 %v1247_v50, %v1233_v47  ;;  %v1195_v54 = vadd.f32 %v4699_v60, %v1145_v52  ;;  %v1211_v55 = vadd.f32 %v1210_v49, %v4762_v37  ;;  %v3486_v36 = vpop.f32.mrb[14].mxu0  ;;  %v4790_v62 = vsub.s32 0, %v1271_v45  ;;  %v1200_v47 = vld [vmem:[%s5473_s4] sm:$0x1] }
 0x1df   :  { %v1148_v63 = vpop.f32.mrb[15].mxu0  ;;  %v4779_v9 = vadd.f32 %v3486_v36, %v4699_v60  ;;  %v1237_v12 = vmul.f32 %v4775_v59, %v4775_v59 }
 0x1e0   :  { %v1212_v2 = vadd.f32 %v1211_v55, %v1195_v54  ;;  %v1235_v4 = vmul.f32 %v1195_v54, %v1195_v54  ;;  %v1249_v7 = vadd.f32 %v1248_v30, %v1234_v53  ;;  %v1196_v6 = vadd.f32 %v4699_v60, %v1148_v63 }
 0x1e1   :  { %v1238_v15 = vmul.f32 %v4779_v9, %v4779_v9 }
 0x1e2   :  { %v1250_v0 = vadd.f32 %v1249_v7, %v1235_v4  ;;  %v1213_v10 = vadd.f32 %v1212_v2, %v1196_v6  ;;  %v1236_v11 = vmul.f32 %v1196_v6, %v1196_v6 }
 0x1e4   :  { %v1214_v13 = vadd.f32 %v1213_v10, %v4775_v59  ;;  %v1251_v14 = vadd.f32 %v1250_v0, %v1236_v11 }
 0x1e6   :  { %v1215_v16 = vadd.f32 %v1214_v13, %v4779_v9  ;;  %v1252_v18 = vadd.f32 %v1251_v14, %v1237_v12 }
 0x1e8   :  { %v1216_v61 = vrot.slane %v1215_v16, 4  ;;  %v1253_v20 = vadd.f32 %v1252_v18, %v1238_v15 }
 0x1ea   :  { %v1217_v27 = vadd.f32 %v1216_v61, %v1215_v16  ;;  %v1254_v21 = vrot.slane %v1253_v20, 4 }
 0x1ec   :  { %v1218_v60 = vrot.slane %v1217_v27, 2  ;;  %v1255_v22 = vadd.f32 %v1254_v21, %v1253_v20 }
 0x1ee   :  { %v1219_v24 = vadd.f32 %v1218_v60, %v1217_v27  ;;  %v1256_v31 = vrot.slane %v1255_v22, 2 }
 0x1f0   :  { %v1220_v25 = vrot.slane %v1219_v24, 1  ;;  %v1257_v28 = vadd.f32 %v1256_v31, %v1255_v22 }
 0x1f2   :  { %v1221_v29 = vadd.f32 %v1220_v25, %v1219_v24  ;;  %v1258_v32 = vrot.slane %v1257_v28, 1 }
 0x1f4   :  { %v1222_v33 = vmul.f32 0.0078125, %v1221_v29  ;;  %v1259_v34 = vadd.f32 %v1258_v32, %v1257_v28 }
 0x1f6   :  { %v1260_v5 = vmul.f32 0.0078125, %v1259_v34  ;;  %v1261_v35 = vmul.f32 %v1222_v33, %v1222_v33 }
 0x1f8   :  { %v1262_v46 = vsub.f32 %v1260_v5, %v1261_v35 }
 0x1fa   :  { %v1263_v39 = vmax.f32 %v1262_v46, 0.0 }
 0x1fc   :  { %v1264_v41 = vadd.f32 1e-05, %v1263_v39 }
 0x1fe   :  { %4050 = vrsqrt.f32 %v1264_v41 }
 0x208   :  { %v4051_v43 = vpop.eup %4050 }
 0x209   :  { %v1266_v44 = vmul.f32 %v4051_v43, %v1199_v57 }
 0x20b   :  { %v1267_v49 = vmul.f32 %v1266_v44, %v1222_v33  ;;  %v1273_v50 = vrot.slane %v1266_v44, %v4790_v62 }
 0x20d   :  { %v1268_v51 = vsub.f32 %v1200_v47, %v1267_v49  ;;  %v1288_v52 = vmul.f32 %v1273_v50, %v1196_v6  ;;  %v1275_v53 = vmul.f32 %v1273_v50, %v4702_v3  ;;  %v1276_v30 = vmul.f32 %v1273_v50, %v4708_v1 }
 0x20e   :  { %v1283_v55 = vmul.f32 %v1273_v50, %v4749_v38  ;;  %v1284_v36 = vmul.f32 %v1273_v50, %v4759_v58  ;;  %v1277_v63 = vmul.f32 %v1273_v50, %v4705_v48  ;;  %v1278_v2 = vmul.f32 %v1273_v50, %v4713_v8 }
 0x20f   :  { %v1295_v4 = vrot.slane %v1268_v51, %v4790_v62  ;;  %v1285_v7 = vmul.f32 %v1273_v50, %v4753_v40  ;;  %v1286_v0 = vmul.f32 %v1273_v50, %v4762_v37  ;;  %v1279_v6 = vmul.f32 %v1273_v50, %v4725_v17 }
 0x210   :  { %v1280_v3 = vmul.f32 %v1273_v50, %v4735_v23  ;;  %v1287_v10 = vmul.f32 %v1273_v50, %v1195_v54  ;;  %v1281_v1 = vmul.f32 %v1273_v50, %v4729_v19  ;;  %v1282_v38 = vmul.f32 %v1273_v50, %v4738_v26 }
 0x211   :  { %v1310_v58 = vadd.f32 %v1295_v4, %v1288_v52  ;;  %v1297_v11 = vadd.f32 %v1295_v4, %v1275_v53  ;;  %v1298_v48 = vadd.f32 %v1295_v4, %v1276_v30  ;;  %v1305_v12 = vadd.f32 %v1295_v4, %v1283_v55 }
 0x212   :  { %v1306_v8 = vadd.f32 %v1295_v4, %v1284_v36  ;;  %v1299_v13 = vadd.f32 %v1295_v4, %v1277_v63  ;;  %v1300_v14 = vadd.f32 %v1295_v4, %v1278_v2  ;;  %v1307_v15 = vadd.f32 %v1295_v4, %v1285_v7  ;;  %v3996_v63 = vld [vmem:[%s5474_s5] sm:$0xff]   ;;  %v3997_v2 = vld [vmem:[%s5474_s5 + $0x148] sm:$0xff]  }
 0x213   :  { %v4809_v40 = vmax.f32 %v1310_v58, 0.0  ;;  %v4811_v37 = vmax.f32 %v1297_v11, 0.0  ;;  %v1314_v17 = vmax.f32 %v1298_v48, 0.0  ;;  %v4813_v16 = vmax.f32 %v1305_v12, 0.0  ;;  %v4000_v58 = vld [vmem:[%s5474_s5 + $0x150] sm:$0xff]  }
 0x214   :  { %v1322_v23 = vmax.f32 %v1306_v8, 0.0  ;;  %v4815_v54 = vmax.f32 %v1299_v13, 0.0  ;;  %v4817_v19 = vmax.f32 %v1300_v14, 0.0  ;;  %v1308_v26 = vadd.f32 %v1295_v4, %v1286_v0  ;;  %v3998_v0 = vld [vmem:[%s5474_s5 + $0x48] sm:$0xff]  }
 0x215   :  { %1383 = vst [vmem:[#allocation3 + $0x101] sm:$0xff] %v4809_v40  ;;  %1370 = vst [vmem:[#allocation3 + $0x11] sm:$0xff] %v4811_v37  ;;  %v1556_v18 = vpack.c.bf16 %v1314_v17, %v4811_v37  ;;  %v1323_v61 = vmax.f32 %v1307_v15, 0.0  ;;  %v1301_v20 = vadd.f32 %v1295_v4, %v1279_v6  ;;  %v1302_v27 = vadd.f32 %v1295_v4, %v1280_v3 }
 0x216   :  { %1371 = vst [vmem:[#allocation3 + $0x21] sm:$0xff] %v1314_v17  ;;  %1378 = vst [vmem:[#allocation3 + $0xb1] sm:$0xff] %v4813_v16  ;;  %v1568_v21 = vpack.c.bf16 %v1322_v23, %v4813_v16  ;;  %v1559_v60 = vpack.c.bf16 %v4817_v19, %v4815_v54  ;;  %v1324_v22 = vmax.f32 %v1308_v26, 0.0  ;;  %v1309_v24 = vadd.f32 %v1295_v4, %v1287_v10  ;;  %v4005_v26 = vld [vmem:[%s5474_s5 + $0x18] sm:$0xff]  }
 0x217   :  { %1379 = vst [vmem:[#allocation3 + $0xc1] sm:$0xff] %v1322_v23  ;;  %1372 = vst [vmem:[#allocation3 + $0x31] sm:$0xff] %v4815_v54  ;;  %1804 = vmatprep.mubr.bf16.mxu0 %v1556_v18  ;;  %v4828_v31 = vmax.f32 %v1301_v20, 0.0  ;;  %v4830_v25 = vmax.f32 %v1302_v27, 0.0  ;;  %v1303_v28 = vadd.f32 %v1295_v4, %v1281_v1  ;;  %v1304_v29 = vadd.f32 %v1295_v4, %v1282_v38  ;;  %v3999_v1 = vld [vmem:[%s5474_s5 + $0x8] sm:$0xff]   ;;  %v4006_v18 = vld [vmem:[%s5474_s5 + $0x160] sm:$0xff]  }
 0x218   :  { %1373 = vst [vmem:[#allocation3 + $0x41] sm:$0xff] %v4817_v19  ;;  %1380 = vst [vmem:[#allocation3 + $0xd1] sm:$0xff] %v1323_v61  ;;  %1836 = vmatprep.mubr.bf16.mxu1 %v1568_v21  ;;  %v1571_v32 = vpack.c.bf16 %v1324_v22, %v1323_v61  ;;  %v4832_v33 = vmax.f32 %v1309_v24, 0.0  ;;  %v1289_v34 = vmul.f32 %v1273_v50, %v4775_v59  ;;  %v4007_v27 = vld [vmem:[%s5474_s5 + $0x60] sm:$0xff]   ;;  %v4009_v24 = vld [vmem:[%s5474_s5 + $0x168] sm:$0xff]  }
 0x219   :  { %1381 = vst [vmem:[#allocation3 + $0xe1] sm:$0xff] %v1324_v22  ;;  %v1290_v5 = vmul.f32 %v1273_v50, %v4779_v9  ;;  %1374 = vst [vmem:[#allocation3 + $0x51] sm:$0xff] %v4828_v31  ;;  %v1562_v35 = vpack.c.bf16 %v4830_v25, %v4828_v31  ;;  %v4840_v46 = vmax.f32 %v1303_v28, 0.0  ;;  %v4842_v39 = vmax.f32 %v1304_v29, 0.0  ;;  %v4012_v28 = vld [vmem:[%s5474_s5 + $0x170] sm:$0xff]  }
 0x21a   :  { %1375 = vst [vmem:[#allocation3 + $0x61] sm:$0xff] %v4830_v25  ;;  %1382 = vst [vmem:[#allocation3 + $0xf1] sm:$0xff] %v4832_v33  ;;  %v1574_v41 = vpack.c.bf16 %v4809_v40, %v4832_v33  ;;  %v1311_v42 = vadd.f32 %v1295_v4, %v1289_v34  ;;  %v4848_v9 = vpack.c.bf16 %v4815_v54, %v1314_v17  ;;  %v4002_v17 = vld [vmem:[%s5474_s5 + $0x10] sm:$0xff]  }
 0x21b   :  { %v1312_v59 = vadd.f32 %v1295_v4, %v1290_v5  ;;  %1376 = vst [vmem:[#allocation3 + $0x71] sm:$0xff] %v4840_v46  ;;  %1377 = vst [vmem:[#allocation3 + $0x81] sm:$0xff] %v4842_v39  ;;  %v1565_v45 = vpack.c.bf16 %v4842_v39, %v4840_v46  ;;  %v4856_v57 = vpack.c.bf16 %v4828_v31, %v4817_v19  ;;  %v4004_v19 = vld [vmem:[%s5474_s5 + $0x58] sm:$0xff]   ;;  %v4010_v31 = vld [vmem:[%s5474_s5 + $0x68] sm:$0xff]  }
 0x21c   :  { %v4860_v43 = vpack.c.bf16 %v4840_v46, %v4830_v25  ;;  %v4862_v44 = vld [vmem:[#allocation3 + $0x10] sm:$0xff]  ;;  %v4868_v50 = vmax.f32 %v1311_v42, 0.0  ;;  %v4872_v52 = vpack.c.bf16 %v1323_v61, %v1322_v23  ;;  %v4875_v53 = vpack.c.bf16 %v4832_v33, %v1324_v22  ;;  %v1520_v12 = vld [vmem:[#allocation3 + $0x100] sm:$0xff]  ;;  %v4003_v23 = vld [vmem:[%s5474_s5 + $0x158] sm:$0xff]  }
 0x21d   :  { %v4864_v47 = vld [vmem:[#allocation3 + $0x20] sm:$0xff]  ;;  %v4866_v49 = vld [vmem:[#allocation3 + $0xb0] sm:$0xff]  ;;  %v4870_v51 = vmax.f32 %v1312_v59, 0.0  ;;  %v4011_v25 = vld [vmem:[%s5474_s5 + $0x28] sm:$0xff]  }
 0x21e   :  { %v1555_v30 = vpack.c.bf16 %v4864_v47, %v4862_v44  ;;  %v1516_v55 = vld [vmem:[#allocation3 + $0xc0] sm:$0xff]  ;;  %1384 = vst [vmem:[#allocation3 + $0x111] sm:$0xff] %v4868_v50  ;;  %v1456_v3 = vpack.c.bf16 %v4868_v50, %v4809_v40  ;;  %v4904_v11 = vld [vmem:[#allocation3 + $0x30] sm:$0xff] }
 0x21f   :  { %v1567_v36 = vpack.c.bf16 %v1516_v55, %v4866_v49  ;;  %v1517_v4 = vld [vmem:[#allocation3 + $0xd0] sm:$0xff]  ;;  %1385 = vst [vmem:[#allocation3 + $0x121] sm:$0xff] %v4870_v51  ;;  %v1577_v7 = vpack.c.bf16 %v4870_v51, %v4868_v50  ;;  %v4906_v48 = vld [vmem:[#allocation3 + $0x40] sm:$0xff] }
 0x220   :  { %1805 = vmatmul.mubr.bf16.vlgmr.msra.gmra.mrb[16].mxu0 %v1555_v30  ;;  %v4893_v6 = vpack.c.bf16 %v1517_v4, %v1516_v55  ;;  %v1518_v10 = vld [vmem:[#allocation3 + $0xe0] sm:$0xff]  ;;  %v1558_v13 = vpack.c.bf16 %v4906_v48, %v4904_v11  ;;  %v4932_v61 = vld [vmem:[#allocation3 + $0x50] sm:$0xff]  ;;  %v4015_v30 = vld [vmem:[%s5474_s5 + $0x178] sm:$0xff]  }
 0x221   :  { %1837 = vmatmul.mubr.bf16.vlgmr.msra.gmra.mrb[0].mxu1 %v1567_v36  ;;  %1812 = vmatprep.mubr.bf16.mxu0 %v1559_v60  ;;  %v1519_v38 = vld [vmem:[#allocation3 + $0xf0] sm:$0xff]  ;;  %v1570_v15 = vpack.c.bf16 %v1518_v10, %v1517_v4  ;;  %v4934_v20 = vld [vmem:[#allocation3 + $0x60] sm:$0xff]  ;;  %v4016_v36 = vld [vmem:[%s5474_s5 + $0x78] sm:$0xff]  }
 0x222   :  { %3488 = vmatpush3.bf16.msra.mxu1 %v4690_v56  ;;  %1844 = vmatprep.mubr.bf16.mxu1 %v1571_v32  ;;  %v4001_v56 = vld [vmem:[%s5474_s5 + $0x50] sm:$0xff]   ;;  %v4911_v8 = vpack.c.bf16 %v1519_v38, %v1518_v10  ;;  %v1561_v21 = vpack.c.bf16 %v4934_v20, %v4932_v61  ;;  %v1573_v60 = vpack.c.bf16 %v1520_v12, %v1519_v38  ;;  %v4008_v22 = vld [vmem:[%s5474_s5 + $0x20] sm:$0xff]  }
 0x223   :  { %3274 = vmatpush3.bf16.msra.mxu0 %v3996_v63  ;;  %3489 = vmatprep.subr.bf16.mxu1 %v3997_v2  ;;  %v4959_v29 = vld [vmem:[#allocation3 + $0x70] sm:$0xff]  ;;  %v4961_v32 = vld [vmem:[#allocation3 + $0x80] sm:$0xff] }
 0x224   :  { %3275 = vmatprep.subr.bf16.mxu0 %v3998_v0  ;;  %v4013_v34 = vld [vmem:[%s5474_s5 + $0x70] sm:$0xff]   ;;  %v1402_v5 = vld [vmem:[#allocation3 + $0x1] sm:$0xff] }
 0x225   :  { %v1521_v14 = vld [vmem:[#allocation3 + $0x110] sm:$0xff]  ;;  %v4970_v46 = vld [vmem:[#allocation3 + $0x22] sm:$0xff] }
 0x226   :  { %3490 = vmatpush3.bf16.msra.mxu1 %v3997_v2  ;;  %v4921_v54 = vpack.c.bf16 %v1521_v14, %v1520_v12  ;;  %v4963_v33 = vld [vmem:[#allocation3 + $0x120] sm:$0xff]  ;;  %v4014_v59 = vld [vmem:[%s5474_s5 + $0x30] sm:$0xff]  }
 0x227   :  { %3276 = vmatpush3.bf16.msra.mxu0 %v3999_v1  ;;  %3491 = vmatprep.subr.bf16.mxu1 %v4000_v58  ;;  %v1576_v42 = vpack.c.bf16 %v4963_v33, %v1521_v14  ;;  %v4018_v63 = vld [vmem:[%s5474_s5 + $0x80] sm:$0xff]   ;;  %v4993_v2 = vld [vmem:[#allocation3 + $0x32] sm:$0xff]  ;;  %v5026_v14 = vld [vmem:[%s5474_s5 + $0x1c8] sm:$0xff]  }
 0x228   :  { %1813 = vmatmul.mubr.bf16.gmra.mrb[20].mxu0 %v1558_v13  ;;  %3277 = vmatprep.subr.bf16.mxu0 %v4001_v56  ;;  %v4995_v4 = vld [vmem:[#allocation3 + $0x42] sm:$0xff]  ;;  %v5002_v0 = vld [vmem:[#allocation3 + $0x52] sm:$0xff] }
 0x229   :  { %1845 = vmatmul.mubr.bf16.gmra.mrb[4].mxu1 %v1570_v15  ;;  %1820 = vmatprep.mubr.bf16.mxu0 %v1562_v35  ;;  %v4968_v35 = vld [vmem:[#allocation3 + $0x12] sm:$0xff]  ;;  %v5004_v10 = vld [vmem:[#allocation3 + $0x62] sm:$0xff]  ;;  %v1560_v1 = vpack.c.bf16 %v4995_v4, %v4993_v2 }
 0x22a   :  { %3492 = vmatpush3.bf16.msra.mxu1 %v4000_v58  ;;  %1852 = vmatprep.mubr.bf16.mxu1 %v1574_v41  ;;  %v1564_v41 = vpack.c.bf16 %v4961_v32, %v4959_v29  ;;  %v1557_v55 = vpack.c.bf16 %v4970_v46, %v4968_v35  ;;  %v5008_v38 = vld [vmem:[#allocation3] sm:$0xff]  ;;  %v4019_v56 = vld [vmem:[%s5474_s5 + $0x88] sm:$0xff]   ;;  %v1563_v13 = vpack.c.bf16 %v5004_v10, %v5002_v0  ;;  %v5032_v15 = vld [vmem:[#allocation3 + $0x72] sm:$0xff] }
 0x22b   :  { %3278 = vmatpush3.bf16.msra.mxu0 %v4002_v17  ;;  %3493 = vmatprep.subr.bf16.mxu1 %v4003_v23  ;;  %v1434_v58 = vpack.c.bf16 %v4862_v44, %v5008_v38  ;;  %v5019_v12 = vld [vmem:[%s5474_s5 + $0x180] sm:$0xff]   ;;  %v4020_v44 = vld [vmem:[%s5474_s5 + $0x90] sm:$0xff]  }
 0x22c   :  { %3279 = vmatprep.subr.bf16.mxu0 %v4004_v19  ;;  %v5034_v17 = vld [vmem:[#allocation3 + $0x82] sm:$0xff]  ;;  %v5046_v19 = vld [vmem:[%s5474_s5 + $0x1d0] sm:$0xff]  }
 0x22d   :  { %v4042_v40 = vld [vmem:[%s5474_s5 + $0x200] sm:$0xff]  }
 0x22e   :  { %3494 = vmatpush3.bf16.msra.mxu1 %v4003_v23  ;;  %v5040_v23 = vld [vmem:[%s5474_s5 + $0x188] sm:$0xff]  }
 0x22f   :  { %3280 = vmatpush3.bf16.msra.mxu0 %v4005_v26  ;;  %3495 = vmatprep.subr.bf16.mxu1 %v4006_v18  ;;  %v5048_v26 = vld [vmem:[#allocation3 + $0xb2] sm:$0xff] }
 0x230   :  { %1821 = vmatmul.mubr.bf16.gmra.mrb[24].mxu0 %v1561_v21  ;;  %3281 = vmatprep.subr.bf16.mxu0 %v4007_v27  ;;  %v1566_v27 = vpack.c.bf16 %v5034_v17, %v5032_v15  ;;  %v5056_v21 = vpack.c.bf16 %v4904_v11, %v4864_v47  ;;  %v5073_v47 = vld [vmem:[%s5474_s5 + $0x1d8] sm:$0xff]   ;;  %v4022_v11 = vld [vmem:[%s5474_s5 + $0xa0] sm:$0xff]  }
 0x231   :  { %1853 = vmatmul.mubr.bf16.gmra.mrb[8].mxu1 %v1573_v60  ;;  %1828 = vmatprep.mubr.bf16.mxu0 %v1565_v45  ;;  %v1435_v45 = vpack.c.bf16 %v4811_v37, %v1402_v5  ;;  %v4017_v37 = vld [vmem:[%s5474_s5 + $0x38] sm:$0xff]  }
 0x232   :  { %3496 = vmatpush3.bf16.msra.mxu1 %v4006_v18  ;;  %1860 = vmatprep.mubr.bf16.mxu1 %v1577_v7  ;;  %v5000_v7 = vld [vmem:[%s5474_s5 + $0x1c0] sm:$0xff]   ;;  %v4021_v60 = vld [vmem:[%s5474_s5 + $0x98] sm:$0xff]  }
 0x233   :  { %3282 = vmatpush3.bf16.msra.mxu0 %v4008_v22  ;;  %3497 = vmatprep.subr.bf16.mxu1 %v4009_v24  ;;  %v5050_v18 = vld [vmem:[#allocation3 + $0xc2] sm:$0xff]  ;;  %v5065_v22 = vld [vmem:[%s5474_s5 + $0x190] sm:$0xff]  }
 0x234   :  { %3283 = vmatprep.subr.bf16.mxu0 %v4010_v31  ;;  %v5080_v31 = vld [vmem:[#allocation3 + $0xd2] sm:$0xff] }
 0x235   :  { %v5096_v5 = vld [vmem:[#allocation3 + $0xf2] sm:$0xff] }
 0x236   :  { %3498 = vmatpush3.bf16.msra.mxu1 %v4009_v24  ;;  %v1569_v24 = vpack.c.bf16 %v5050_v18, %v5048_v26 }
 0x237   :  { %3284 = vmatpush3.bf16.msra.mxu0 %v4011_v25  ;;  %3499 = vmatprep.subr.bf16.mxu1 %v4012_v28  ;;  %v5082_v25 = vld [vmem:[#allocation3 + $0xe2] sm:$0xff] }
 0x238   :  { %1829 = vmatmul.mubr.bf16.gmra.mrb[28].mxu0 %v1564_v41  ;;  %3285 = vmatprep.subr.bf16.mxu0 %v4013_v34  ;;  %v5094_v34 = vld [vmem:[%s5474_s5 + $0x1e0] sm:$0xff]  }
 0x239   :  { %1861 = vmatmul.mubr.bf16.gmra.mrb[12].mxu1 %v1576_v42  ;;  %2142 = vmatprep.mubr.bf16.mxu0 %v1435_v45  ;;  %v5098_v41 = vld [vmem:[#allocation3 + $0x102] sm:$0xff]  ;;  %v1572_v42 = vpack.c.bf16 %v5082_v25, %v5080_v31 }
 0x23a   :  { %3500 = vmatpush3.bf16.msra.mxu1 %v4012_v28  ;;  %3503 = vmatprep.mubr.bf16.mxu1 %v1557_v55  ;;  %v5088_v28 = vld [vmem:[%s5474_s5 + $0x198] sm:$0xff]   ;;  %v4023_v45 = vld [vmem:[%s5474_s5 + $0xa8] sm:$0xff]   ;;  %v1575_v55 = vpack.c.bf16 %v5098_v41, %v5096_v5 }
 0x23b   :  { %3286 = vmatpush3.bf16.msra.mxu0 %v4014_v59  ;;  %3501 = vmatprep.subr.bf16.mxu1 %v4015_v30  ;;  %v5104_v59 = vpack.c.bf16 %v4932_v61, %v4906_v48  ;;  %v5121_v48 = vld [vmem:[%s5474_s5 + $0x1e8] sm:$0xff]   ;;  %v4024_v61 = vld [vmem:[%s5474_s5 + $0xb0] sm:$0xff]  }
 0x23c   :  { %3287 = vmatprep.subr.bf16.mxu0 %v4016_v36  ;;  %v5128_v36 = vld [vmem:[#allocation3 + $0x112] sm:$0xff] }
 0x23e   :  { %3502 = vmatpush3.bf16.msra.mxu1 %v4015_v30  ;;  %v5113_v30 = vld [vmem:[%s5474_s5 + $0x1a0] sm:$0xff]  }
 0x23f   :  { %3288 = vmatpush3.bf16.msra.mxu0 %v4017_v37  ;;  %3519 = vmatprep.subr.bf16.mxu1 %v4018_v63  ;;  %v5130_v37 = vld [vmem:[#allocation3 + $0x122] sm:$0xff] }
 0x240   :  { %3353 = vmatprep.subr.bf16.mxu0 %v5000_v7 }
 0x241   :  { %3504 = vmatmul.mubr.bf16.vlgmr.msra.gmra.mrb[16].mxu1 %v1560_v1  ;;  %v4038_v1 = vld [vmem:[%s5474_s5 + $0x1f0] sm:$0xff]  }
 0x242   :  { %2143 = vmatmul.mubr.bf16.vlgmr.msra.gmra.mrb[32].mxu0 %v1434_v58  ;;  %3520 = vmatpush3.bf16.msra.mxu1 %v4018_v63  ;;  %v4037_v63 = vld [vmem:[%s5474_s5 + $0x1a8] sm:$0xff]  }
 0x243   :  { %3507 = vmatprep.mubr.bf16.mxu1 %v1563_v13  ;;  %2150 = vmatprep.mubr.bf16.mxu0 %v4848_v9  ;;  %v1410_v58 = vld [vmem:[#allocation3 + $0xa1] sm:$0xff]  ;;  %v1578_v13 = vpack.c.bf16 %v5130_v37, %v5128_v36 }
 0x244   :  { %3521 = vmatprep.subr.bf16.mxu1 %v4019_v56  ;;  %3354 = vmatpush3.bf16.msra.mxu0 %v5019_v12 }
 0x245   :  { %3355 = vmatprep.subr.bf16.mxu0 %v5026_v14 }
 0x246   :  { %3522 = vmatpush3.bf16.msra.mxu1 %v4019_v56  ;;  %v1418_v56 = vld [vmem:[#allocation3 + $0x2] sm:$0xff] }
 0x247   :  { %3523 = vmatprep.subr.bf16.mxu1 %v4020_v44 }
 0x248   :  { %3356 = vmatpush3.bf16.msra.mxu0 %v5040_v23 }
 0x249   :  { %3508 = vmatmul.mubr.bf16.gmra.mrb[20].mxu1 %v1566_v27  ;;  %3357 = vmatprep.subr.bf16.mxu0 %v5046_v19  ;;  %v4025_v27 = vld [vmem:[%s5474_s5 + $0xb8] sm:$0xff]  }
 0x24a   :  { %2151 = vmatmul.mubr.bf16.gmra.mrb[36].mxu0 %v5056_v21  ;;  %3524 = vmatpush3.bf16.msra.mxu1 %v4020_v44  ;;  %v5144_v44 = vpack.c.bf16 %v4959_v29, %v4934_v20  ;;  %v4040_v20 = vld [vmem:[%s5474_s5 + $0x1f8] sm:$0xff]  }
 0x24b   :  { %3511 = vmatprep.mubr.bf16.mxu1 %v1569_v24  ;;  %2158 = vmatprep.mubr.bf16.mxu0 %v4856_v57  ;;  %v1447_v24 = vpack.c.bf16 %v4813_v16, %v1410_v58  ;;  %v4041_v29 = vld [vmem:[%s5474_s5 + $0x1b8] sm:$0xff]   ;;  %v5164_v16 = vpack.c.bf16 %v4993_v2, %v4970_v46  ;;  %v1426_v46 = vld [vmem:[#allocation3 + $0xa2] sm:$0xff] }
 0x24c   :  { %3525 = vmatprep.subr.bf16.mxu1 %v4021_v60  ;;  %3358 = vmatpush3.bf16.msra.mxu0 %v5065_v22  ;;  %v1448_v2 = vpack.c.bf16 %v5048_v26, %v1426_v46 }
 0x24d   :  { %3359 = vmatprep.subr.bf16.mxu0 %v5073_v47 }
 0x24e   :  { %3526 = vmatpush3.bf16.msra.mxu1 %v4021_v60  ;;  %v4039_v60 = vld [vmem:[%s5474_s5 + $0x1b0] sm:$0xff]  }
 0x24f   :  { %3527 = vmatprep.subr.bf16.mxu1 %v4022_v11 }
 0x250   :  { %3360 = vmatpush3.bf16.msra.mxu0 %v5088_v28 }
 0x251   :  { %3512 = vmatmul.mubr.bf16.gmra.mrb[24].mxu1 %v1572_v42  ;;  %3361 = vmatprep.subr.bf16.mxu0 %v5094_v34  ;;  %v5171_v42 = vpack.c.bf16 %v5002_v0, %v4995_v4  ;;  %v5193_v4 = vpack.c.bf16 %v5080_v31, %v5050_v18  ;;  %v1457_v0 = vpack.c.bf16 %v5128_v36, %v5098_v41 }
 0x252   :  { %2159 = vmatmul.mubr.bf16.gmra.mrb[40].mxu0 %v5104_v59  ;;  %3528 = vmatpush3.bf16.msra.mxu1 %v4022_v11  ;;  %v1436_v11 = vpack.c.bf16 %v4968_v35, %v1418_v56  ;;  %v1446_v35 = vpack.c.bf16 %v4866_v49, %v5008_v38  ;;  %v5181_v49 = vpack.c.bf16 %v5032_v15, %v5004_v10  ;;  %v4045_v10 = vld [vmem:[%s5474_s5 + $0x218] sm:$0xff]   ;;  %v4047_v15 = vld [vmem:[%s5474_s5 + $0x228] sm:$0xff]  }
 0x253   :  { %3515 = vmatprep.mubr.bf16.mxu1 %v1575_v55  ;;  %2166 = vmatprep.mubr.bf16.mxu0 %v4860_v43 }
 0x254   :  { %3529 = vmatprep.subr.bf16.mxu1 %v4023_v45  ;;  %3362 = vmatpush3.bf16.msra.mxu0 %v5113_v30 }
 0x255   :  { %3363 = vmatprep.subr.bf16.mxu0 %v5121_v48 }
 0x256   :  { %3530 = vmatpush3.bf16.msra.mxu1 %v4023_v45 }
 0x257   :  { %3531 = vmatprep.subr.bf16.mxu1 %v4024_v61 }
 0x258   :  { %3364 = vmatpush3.bf16.msra.mxu0 %v4037_v63 }
 0x259   :  { %3516 = vmatmul.mubr.bf16.gmra.mrb[28].mxu1 %v1578_v13  ;;  %3365 = vmatprep.subr.bf16.mxu0 %v4038_v1 }
 0x25a   :  { %2167 = vmatmul.mubr.bf16.gmra.mrb[44].mxu0 %v5144_v44  ;;  %3532 = vmatpush3.bf16.msra.mxu1 %v4024_v61 }
 0x25b   :  { %2174 = vmatprep.mubr.bf16.mxu0 %v1447_v24  ;;  %3535 = vmatprep.mubr.bf16.mxu1 %v1436_v11 }
 0x25c   :  { %3533 = vmatprep.subr.bf16.mxu1 %v4025_v27  ;;  %3366 = vmatpush3.bf16.msra.mxu0 %v4039_v60 }
 0x25d   :  { %3367 = vmatprep.subr.bf16.mxu0 %v4040_v20 }
 0x25e   :  { %3534 = vmatpush3.bf16.msra.mxu1 %v4025_v27 }
 0x25f   :  { %3599 = vmatprep.subr.bf16.mxu1 %v5000_v7  ;;  %v5198_v7 = vpack.c.bf16 %v5096_v5, %v5082_v25 }
 0x260   :  { %3368 = vmatpush3.bf16.msra.mxu0 %v4041_v29 }
 0x261   :  { %3536 = vmatmul.mubr.bf16.vlgmr.msra.gmra.mrb[16].mxu1 %v5164_v16 }
 0x262   :  { %2175 = vmatmul.mubr.bf16.gmra.mrb[48].mxu0 %v1446_v35  ;;  %3607 = vmatpush3.bf16.msra.mxu1 %v5019_v12 }
 0x263   :  { %2182 = vmatprep.mubr.bf16.mxu0 %v4872_v52  ;;  %3539 = vmatprep.mubr.bf16.mxu1 %v5171_v42 }
 0x264   :  { %3600 = vmatprep.subr.bf16.mxu1 %v5026_v14  ;;  %v2362_v14 = vpack.c.bf16 %v5008_v38, %v4961_v32  ;;  %v4049_v32 = vld [vmem:[%s5474_s5 + $0x238] sm:$0xff]  }
 0x266   :  { %3608 = vmatpush3.bf16.msra.mxu1 %v5040_v23  ;;  %v2333_v23 = vld [vmem:[#allocation3 + $0x101] sm:$0xff] }
 0x267   :  { %3601 = vmatprep.subr.bf16.mxu1 %v5046_v19  ;;  %v2336_v19 = vld [vmem:[#allocation3 + $0x131] sm:$0xff] }
 0x268   :  { %v2375_v26 = vpack.c.bf16 %v2336_v19, %v4870_v51  ;;  %v2352_v51 = vld [vmem:[#allocation3 + $0x132] sm:$0xff] }
 0x269   :  { %3540 = vmatmul.mubr.bf16.gmra.mrb[20].mxu1 %v5181_v49 }
 0x26a   :  { %2183 = vmatmul.mubr.bf16.gmra.mrb[52].mxu0 %v4893_v6  ;;  %3609 = vmatpush3.bf16.msra.mxu1 %v5065_v22 }
 0x26b   :  { %2190 = vmatprep.mubr.bf16.mxu0 %v4875_v53  ;;  %3543 = vmatprep.mubr.bf16.mxu1 %v1448_v2 }
 0x26c   :  { %3602 = vmatprep.subr.bf16.mxu1 %v5073_v47 }
 0x26e   :  { %3610 = vmatpush3.bf16.msra.mxu1 %v5088_v28 }
 0x26f   :  { %3603 = vmatprep.subr.bf16.mxu1 %v5094_v34 }
 0x271   :  { %3544 = vmatmul.mubr.bf16.gmra.mrb[24].mxu1 %v5193_v4 }
 0x272   :  { %2191 = vmatmul.mubr.bf16.gmra.mrb[56].mxu0 %v4911_v8  ;;  %3611 = vmatpush3.bf16.msra.mxu1 %v5113_v30 }
 0x273   :  { %2198 = vmatprep.mubr.bf16.mxu0 %v1456_v3  ;;  %3547 = vmatprep.mubr.bf16.mxu1 %v5198_v7  ;;  %v4043_v3 = vld [vmem:[%s5474_s5 + $0x208] sm:$0xff]  }
 0x274   :  { %3604 = vmatprep.subr.bf16.mxu1 %v5121_v48 }
 0x276   :  { %3612 = vmatpush3.bf16.msra.mxu1 %v4037_v63 }
 0x277   :  { %3605 = vmatprep.subr.bf16.mxu1 %v4038_v1 }
 0x279   :  { %3548 = vmatmul.mubr.bf16.gmra.mrb[28].mxu1 %v1457_v0 }
 0x27a   :  { %2199 = vmatmul.mubr.bf16.gmra.mrb[60].mxu0 %v4921_v54  ;;  %3613 = vmatpush3.bf16.msra.mxu1 %v4039_v60 }
 0x27b   :  { %2602 = vmatprep.mubr.bf16.mxu0 %v4848_v9  ;;  %2610 = vmatprep.mubr.bf16.mxu1 %v4856_v57  ;;  %v4044_v9 = vld [vmem:[%s5474_s5 + $0x210] sm:$0xff]  }
 0x27c   :  { %3606 = vmatprep.subr.bf16.mxu1 %v4040_v20  ;;  %v2328_v57 = vld [vmem:[#allocation3 + $0x91] sm:$0xff] }
 0x27d   :  { %v2363_v12 = vpack.c.bf16 %v2328_v57, %v4842_v39  ;;  %v4048_v39 = vld [vmem:[%s5474_s5 + $0x230] sm:$0xff]  }
 0x27e   :  { %3614 = vmatpush3.bf16.msra.mxu1 %v4041_v29 }
 0x27f   :  { %3551 = vmatprep.subr.bf16.mxu1 %v4042_v40 }
 0x281   :  { %2611 = vmatmul.mubr.bf16.vlgmr.msra.gmra.mrb[32].mxu1 %v5104_v59 }
 0x282   :  { %2603 = vmatmul.mubr.bf16.vlgmr.msra.gmra.mrb[64].mxu0 %v5056_v21  ;;  %3552 = vmatpush3.bf16.msra.mxu1 %v4042_v40 }
 0x283   :  { %2618 = vmatprep.mubr.bf16.mxu1 %v4860_v43  ;;  %3553 = vmatprep.subr.bf16.mxu1 %v4043_v3  ;;  %v4046_v43 = vld [vmem:[%s5474_s5 + $0x220] sm:$0xff]  }
 0x286   :  { %3554 = vmatpush3.bf16.msra.mxu1 %v4043_v3 }
 0x287   :  { %3555 = vmatprep.subr.bf16.mxu1 %v4044_v9 }
 0x289   :  { %2619 = vmatmul.mubr.bf16.gmra.mrb[36].mxu1 %v5144_v44 }
 0x28a   :  { %2626 = vmatprep.mubr.bf16.mxu1 %v2363_v12  ;;  %3556 = vmatpush3.bf16.msra.mxu1 %v4044_v9 }
 0x28b   :  { %3557 = vmatprep.subr.bf16.mxu1 %v4045_v10 }
 0x28e   :  { %3558 = vmatpush3.bf16.msra.mxu1 %v4045_v10 }
 0x28f   :  { %3559 = vmatprep.subr.bf16.mxu1 %v4046_v43 }
 0x291   :  { %2627 = vmatmul.mubr.bf16.gmra.mrb[40].mxu1 %v2362_v14 }
 0x292   :  { %2634 = vmatprep.mubr.bf16.mxu1 %v4872_v52  ;;  %3560 = vmatpush3.bf16.msra.mxu1 %v4046_v43  ;;  %v2372_v52 = vpack.c.bf16 %v4868_v50, %v2333_v23  ;;  %v2344_v50 = vld [vmem:[#allocation3 + $0x92] sm:$0xff] }
 0x293   :  { %3561 = vmatprep.subr.bf16.mxu1 %v4047_v15 }
 0x296   :  { %3562 = vmatpush3.bf16.msra.mxu1 %v4047_v15 }
 0x297   :  { %3563 = vmatprep.subr.bf16.mxu1 %v4048_v39 }
 0x299   :  { %2635 = vmatmul.mubr.bf16.gmra.mrb[44].mxu1 %v4893_v6  ;;  %v2374_v6 = vpack.c.bf16 %v5008_v38, %v4963_v33 }
 0x29a   :  { %2642 = vmatprep.mubr.bf16.mxu1 %v4875_v53  ;;  %3564 = vmatpush3.bf16.msra.mxu1 %v4048_v39  ;;  %v2364_v53 = vpack.c.bf16 %v2344_v50, %v5034_v17 }
 0x29b   :  { %3565 = vmatprep.subr.bf16.mxu1 %v4049_v32 }
 0x29e   :  { %3566 = vmatpush3.bf16.msra.mxu1 %v4049_v32 }
 0x2a1   :  { %2643 = vmatmul.mubr.bf16.gmra.mrb[48].mxu1 %v4911_v8  ;;  %v2376_v8 = vpack.c.bf16 %v2352_v51, %v5130_v37 }
 0x2a2   :  { %2650 = vmatprep.mubr.bf16.mxu1 %v2372_v52 }
 0x2a9   :  { %2651 = vmatmul.mubr.bf16.gmra.mrb[52].mxu1 %v4921_v54 }
 0x2aa   :  { %2658 = vmatprep.mubr.bf16.mxu1 %v2375_v26 }
 0x2b1   :  { %2659 = vmatmul.mubr.bf16.gmra.mrb[56].mxu1 %v2374_v6 }
 0x2b2   :  { %3567 = vmatprep.mubr.bf16.mxu1 %v5164_v16 }
 0x2b9   :  { %3568 = vmatmul.mubr.bf16.vlgmr.msra.gmra.mrb[16].mxu1 %v5171_v42 }
 0x2ba   :  { %3571 = vmatprep.mubr.bf16.mxu1 %v5181_v49 }
 0x2c1   :  { %3572 = vmatmul.mubr.bf16.gmra.mrb[20].mxu1 %v2364_v53 }
 0x2c2   :  { %3575 = vmatprep.mubr.bf16.mxu1 %v5193_v4 }
 0x2c9   :  { %3576 = vmatmul.mubr.bf16.gmra.mrb[24].mxu1 %v5198_v7 }
 0x2ca   :  { %3579 = vmatprep.mubr.bf16.mxu1 %v1457_v0 }
 0x2d1   :  { %3580 = vmatmul.mubr.bf16.gmra.mrb[28].mxu1 %v2376_v8 }
 0x2f3   :  { %v3209_v54 = vpop.f32.mrb[16].mxu0 }
 0x2f4   :  { %v3233_v33 = vpop.f32.mrb[0].mxu1  ;;  %v3210_v38 = vpop.f32.mrb[17].mxu0 }
 0x2f5   :  { %v3211_v18 = vadd.f32 %v3210_v38, %v3209_v54  ;;  %v3234_v21 = vpop.f32.mrb[1].mxu1  ;;  %v3212_v22 = vpop.f32.mrb[18].mxu0 }
 0x2f6   :  { %v5259_v47 = vadd.f32 %v3234_v21, %v3233_v33  ;;  %v3236_v31 = vpop.f32.mrb[2].mxu1  ;;  %v3213_v17 = vpop.f32.mrb[19].mxu0 }
 0x2f7   :  { %v3214_v25 = vadd.f32 %v3213_v17, %v3212_v22  ;;  %v3237_v28 = vpop.f32.mrb[3].mxu1 }
 0x2f8   :  { %v5261_v34 = vadd.f32 %v3237_v28, %v3236_v31 }
 0x2fb   :  { %v3215_v5 = vpop.f32.mrb[20].mxu0 }
 0x2fc   :  { %v3239_v41 = vpop.f32.mrb[4].mxu1  ;;  %v3216_v59 = vpop.f32.mrb[21].mxu0 }
 0x2fd   :  { %v3217_v45 = vadd.f32 %v3216_v59, %v3215_v5  ;;  %v3240_v30 = vpop.f32.mrb[5].mxu1  ;;  %v3218_v55 = vpop.f32.mrb[22].mxu0 }
 0x2fe   :  { %v5263_v48 = vadd.f32 %v3240_v30, %v3239_v41  ;;  %v3242_v61 = vpop.f32.mrb[6].mxu1  ;;  %v3219_v36 = vpop.f32.mrb[23].mxu0 }
 0x2ff   :  { %v3220_v37 = vadd.f32 %v3219_v36, %v3218_v55  ;;  %v3243_v63 = vpop.f32.mrb[7].mxu1 }
 0x300   :  { %v5265_v1 = vadd.f32 %v3243_v63, %v3242_v61 }
 0x303   :  { %v3221_v58 = vpop.f32.mrb[24].mxu0 }
 0x304   :  { %v3245_v56 = vpop.f32.mrb[8].mxu1  ;;  %v3222_v13 = vpop.f32.mrb[25].mxu0 }
 0x305   :  { %v3223_v44 = vadd.f32 %v3222_v13, %v3221_v58  ;;  %v3246_v27 = vpop.f32.mrb[9].mxu1  ;;  %v3224_v60 = vpop.f32.mrb[26].mxu0 }
 0x306   :  { %v5267_v24 = vadd.f32 %v3246_v27, %v3245_v56  ;;  %v3248_v11 = vpop.f32.mrb[10].mxu1  ;;  %v3225_v20 = vpop.f32.mrb[27].mxu0 }
 0x307   :  { %v3226_v29 = vadd.f32 %v3225_v20, %v3224_v60  ;;  %v3249_v16 = vpop.f32.mrb[11].mxu1 }
 0x308   :  { %v5269_v35 = vadd.f32 %v3249_v16, %v3248_v11 }
 0x30b   :  { %v3227_v42 = vpop.f32.mrb[28].mxu0 }
 0x30c   :  { %v3251_v46 = vpop.f32.mrb[12].mxu1  ;;  %v3228_v49 = vpop.f32.mrb[29].mxu0 }
 0x30d   :  { %v3229_v2 = vadd.f32 %v3228_v49, %v3227_v42  ;;  %v3252_v4 = vpop.f32.mrb[13].mxu1  ;;  %v3230_v7 = vpop.f32.mrb[30].mxu0 }
 0x30e   :  { %v5271_v0 = vadd.f32 %v3252_v4, %v3251_v46  ;;  %v3254_v40 = vpop.f32.mrb[14].mxu1  ;;  %v3231_v3 = vpop.f32.mrb[31].mxu0 }
 0x30f   :  { %v3232_v9 = vadd.f32 %v3231_v3, %v3230_v7  ;;  %v3255_v57 = vpop.f32.mrb[15].mxu1 }
 0x310   :  { %v5273_v10 = vadd.f32 %v3255_v57, %v3254_v40 }
 0x315   :  { %v3289_v12 = vpop.f32.mrb[32].mxu0 }
 0x316   :  { %v3290_v43 = vpop.f32.mrb[33].mxu0 }
 0x317   :  { %v3291_v14 = vadd.f32 %v3290_v43, %v3289_v12  ;;  %v3292_v15 = vpop.f32.mrb[34].mxu0 }
 0x318   :  { %v3293_v39 = vpop.f32.mrb[35].mxu0 }
 0x319   :  { %v5275_v32 = vadd.f32 %v3291_v14, %v3211_v18  ;;  %v3294_v23 = vadd.f32 %v3293_v39, %v3292_v15 }
 0x31b   :  { %v5277_v52 = vadd.f32 %v3294_v23, %v3214_v25 }
 0x31d   :  { %v3295_v19 = vpop.f32.mrb[36].mxu0 }
 0x31e   :  { %v3296_v26 = vpop.f32.mrb[37].mxu0 }
 0x31f   :  { %v3297_v6 = vadd.f32 %v3296_v26, %v3295_v19  ;;  %v3298_v50 = vpop.f32.mrb[38].mxu0 }
 0x320   :  { %v3299_v53 = vpop.f32.mrb[39].mxu0 }
 0x321   :  { %v3615_v51 = vadd.f32 %v3297_v6, %v3217_v45  ;;  %v3300_v8 = vadd.f32 %v3299_v53, %v3298_v50 }
 0x323   :  { %v5279_v54 = vadd.f32 %v3300_v8, %v3220_v37 }
 0x325   :  { %v3301_v33 = vpop.f32.mrb[40].mxu0 }
 0x326   :  { %v3302_v38 = vpop.f32.mrb[41].mxu0 }
 0x327   :  { %v3303_v21 = vadd.f32 %v3302_v38, %v3301_v33  ;;  %v3304_v22 = vpop.f32.mrb[42].mxu0 }
 0x328   :  { %v3305_v31 = vpop.f32.mrb[43].mxu0 }
 0x329   :  { %v5281_v17 = vadd.f32 %v3303_v21, %v3223_v44  ;;  %v3306_v18 = vadd.f32 %v3305_v31, %v3304_v22 }
 0x32b   :  { %v5283_v28 = vadd.f32 %v3306_v18, %v3226_v29 }
 0x32d   :  { %v3307_v25 = vpop.f32.mrb[44].mxu0 }
 0x32e   :  { %v3308_v5 = vpop.f32.mrb[45].mxu0 }
 0x32f   :  { %v3309_v41 = vadd.f32 %v3308_v5, %v3307_v25  ;;  %v3310_v59 = vpop.f32.mrb[46].mxu0 }
 0x330   :  { %v3311_v30 = vpop.f32.mrb[47].mxu0 }
 0x331   :  { %v5285_v55 = vadd.f32 %v3309_v41, %v3229_v2  ;;  %v3312_v45 = vadd.f32 %v3311_v30, %v3310_v59 }
 0x333   :  { %v5287_v61 = vadd.f32 %v3312_v45, %v3232_v9 }
 0x335   :  { %v3313_v36 = vpop.f32.mrb[48].mxu0 }
 0x336   :  { %v3314_v37 = vpop.f32.mrb[49].mxu0 }
 0x337   :  { %v3315_v63 = vadd.f32 %v3314_v37, %v3313_v36  ;;  %v3316_v58 = vpop.f32.mrb[50].mxu0 }
 0x338   :  { %v3317_v56 = vpop.f32.mrb[51].mxu0 }
 0x339   :  { %v5290_v13 = vadd.f32 %v3315_v63, %v5259_v47  ;;  %v3318_v44 = vadd.f32 %v3317_v56, %v3316_v58 }
 0x33b   :  { %v5293_v27 = vadd.f32 %v3318_v44, %v5261_v34 }
 0x33d   :  { %v3319_v60 = vpop.f32.mrb[52].mxu0 }
 0x33e   :  { %v3320_v11 = vpop.f32.mrb[53].mxu0 }
 0x33f   :  { %v3321_v20 = vadd.f32 %v3320_v11, %v3319_v60  ;;  %v3322_v29 = vpop.f32.mrb[54].mxu0 }
 0x340   :  { %v3323_v16 = vpop.f32.mrb[55].mxu0 }
 0x341   :  { %v5296_v42 = vadd.f32 %v3321_v20, %v5263_v48  ;;  %v3324_v46 = vadd.f32 %v3323_v16, %v3322_v29 }
 0x343   :  { %v5299_v49 = vadd.f32 %v3324_v46, %v5265_v1 }
 0x345   :  { %v3325_v2 = vpop.f32.mrb[56].mxu0 }
 0x346   :  { %v3326_v4 = vpop.f32.mrb[57].mxu0 }
 0x347   :  { %v3327_v47 = vadd.f32 %v3326_v4, %v3325_v2  ;;  %v3328_v7 = vpop.f32.mrb[58].mxu0 }
 0x348   :  { %v3329_v40 = vpop.f32.mrb[59].mxu0 }
 0x349   :  { %v5302_v34 = vadd.f32 %v3327_v47, %v5267_v24  ;;  %v3330_v3 = vadd.f32 %v3329_v40, %v3328_v7 }
 0x34b   :  { %v5305_v9 = vadd.f32 %v3330_v3, %v5269_v35 }
 0x34d   :  { %v3331_v57 = vpop.f32.mrb[60].mxu0 }
 0x34e   :  { %v3332_v12 = vpop.f32.mrb[61].mxu0 }
 0x34f   :  { %v3333_v48 = vadd.f32 %v3332_v12, %v3331_v57  ;;  %v3334_v43 = vpop.f32.mrb[62].mxu0 }
 0x350   :  { %v3335_v14 = vpop.f32.mrb[63].mxu0 }
 0x351   :  { %v5308_v1 = vadd.f32 %v3333_v48, %v5271_v0  ;;  %v3336_v15 = vadd.f32 %v3335_v14, %v3334_v43 }
 0x353   :  { %v5311_v39 = vadd.f32 %v3336_v15, %v5273_v10 }
 0x354   :  { %v3375_v23 = vpop.f32.mrb[32].mxu1 }
 0x355   :  { %v3369_v19 = vpop.f32.mrb[64].mxu0  ;;  %v3376_v24 = vpop.f32.mrb[33].mxu1 }
 0x356   :  { %v3370_v26 = vpop.f32.mrb[65].mxu0  ;;  %v3377_v6 = vadd.f32 %v3376_v24, %v3375_v23  ;;  %v3378_v50 = vpop.f32.mrb[34].mxu1 }
 0x357   :  { %v3371_v35 = vadd.f32 %v3370_v26, %v3369_v19  ;;  %v3372_v53 = vpop.f32.mrb[66].mxu0  ;;  %v3379_v8 = vpop.f32.mrb[35].mxu1 }
 0x358   :  { %v3373_v33 = vpop.f32.mrb[67].mxu0  ;;  %v3380_v38 = vadd.f32 %v3379_v8, %v3378_v50  ;;  %v3616_v21 = vadd.f32 %v3615_v51, %v3377_v6 }
 0x359   :  { %v3374_v22 = vadd.f32 %v3373_v33, %v3372_v53  ;;  %v3619_v0 = vadd.f32 %v5275_v32, %v3371_v35 }
 0x35a   :  { %v3622_v31 = vadd.f32 %v5279_v54, %v3380_v38 }
 0x35b   :  { %v3625_v10 = vadd.f32 %v5277_v52, %v3374_v22 }
 0x35c   :  { %v3381_v18 = vpop.f32.mrb[36].mxu1 }
 0x35d   :  { %v3382_v25 = vpop.f32.mrb[37].mxu1 }
 0x35e   :  { %v3383_v5 = vadd.f32 %v3382_v25, %v3381_v18  ;;  %v3384_v41 = vpop.f32.mrb[38].mxu1 }
 0x35f   :  { %v3385_v59 = vpop.f32.mrb[39].mxu1 }
 0x360   :  { %v3386_v30 = vadd.f32 %v3385_v59, %v3384_v41  ;;  %v5317_v45 = vadd.f32 %v5281_v17, %v3383_v5 }
 0x362   :  { %v5320_v36 = vadd.f32 %v5283_v28, %v3386_v30 }
 0x364   :  { %v3387_v51 = vpop.f32.mrb[40].mxu1 }
 0x365   :  { %v3388_v37 = vpop.f32.mrb[41].mxu1 }
 0x366   :  { %v3389_v63 = vadd.f32 %v3388_v37, %v3387_v51  ;;  %v3390_v32 = vpop.f32.mrb[42].mxu1 }
 0x367   :  { %v3391_v58 = vpop.f32.mrb[43].mxu1 }
 0x368   :  { %v3392_v54 = vadd.f32 %v3391_v58, %v3390_v32  ;;  %v3628_v52 = vadd.f32 %v5285_v55, %v3389_v63 }
 0x36a   :  { %v3634_v56 = vadd.f32 %v5287_v61, %v3392_v54 }
 0x36c   :  { %v3393_v44 = vpop.f32.mrb[44].mxu1 }
 0x36d   :  { %v3394_v60 = vpop.f32.mrb[45].mxu1 }
 0x36e   :  { %v3395_v11 = vadd.f32 %v3394_v60, %v3393_v44  ;;  %v3396_v20 = vpop.f32.mrb[46].mxu1 }
 0x36f   :  { %v3397_v29 = vpop.f32.mrb[47].mxu1 }
 0x370   :  { %v3398_v17 = vadd.f32 %v3397_v29, %v3396_v20  ;;  %v5325_v16 = vadd.f32 %v5290_v13, %v3395_v11 }
 0x372   :  { %v5328_v28 = vadd.f32 %v5293_v27, %v3398_v17 }
 0x374   :  { %v3399_v46 = vpop.f32.mrb[48].mxu1 }
 0x375   :  { %v3400_v2 = vpop.f32.mrb[49].mxu1 }
 0x376   :  { %v3401_v4 = vadd.f32 %v3400_v2, %v3399_v46  ;;  %v3402_v47 = vpop.f32.mrb[50].mxu1 }
 0x377   :  { %v3403_v7 = vpop.f32.mrb[51].mxu1 }
 0x378   :  { %v3404_v55 = vadd.f32 %v3403_v7, %v3402_v47  ;;  %v3640_v61 = vadd.f32 %v5296_v42, %v3401_v4 }
 0x37a   :  { %v5332_v40 = vadd.f32 %v5299_v49, %v3404_v55 }
 0x37c   :  { %v3405_v3 = vpop.f32.mrb[52].mxu1 }
 0x37d   :  { %v3406_v57 = vpop.f32.mrb[53].mxu1 }
 0x37e   :  { %v3407_v12 = vadd.f32 %v3406_v57, %v3405_v3  ;;  %v3408_v48 = vpop.f32.mrb[54].mxu1 }
 0x37f   :  { %v3409_v13 = vpop.f32.mrb[55].mxu1 }
 0x380   :  { %v3410_v43 = vadd.f32 %v3409_v13, %v3408_v48  ;;  %v5335_v27 = vadd.f32 %v5302_v34, %v3407_v12  ;;  %v5349_v34 = vld [vmem:[%s5475_s6] ss:$0 sm:$0xff] }
 0x382   :  { %v5338_v14 = vadd.f32 %v5305_v9, %v3410_v43 }
 0x384   :  { %v3411_v15 = vpop.f32.mrb[56].mxu1 }
 0x385   :  { %v3412_v23 = vpop.f32.mrb[57].mxu1 }
 0x386   :  { %v3413_v19 = vadd.f32 %v3412_v23, %v3411_v15  ;;  %v3414_v24 = vpop.f32.mrb[58].mxu1 }
 0x387   :  { %v3415_v42 = vpop.f32.mrb[59].mxu1 }
 0x388   :  { %v3416_v26 = vadd.f32 %v3415_v42, %v3414_v24  ;;  %v5341_v49 = vadd.f32 %v5308_v1, %v3413_v19 }
 0x38a   :  { %v5344_v6 = vadd.f32 %v5311_v39, %v3416_v26 }
 0x38c   :  { %v3569_v50 = vpop.f32.mrb[16].mxu1 }
 0x38d   :  { %v3617_v35 = vadd.f32 %v3616_v21, %v3569_v50  ;;  %v2701_v9 = vpop.f32.mrb[17].mxu1 }
 0x38e   :  { %v3620_v53 = vadd.f32 %v3619_v0, %v2701_v9  ;;  %v3570_v8 = vpop.f32.mrb[18].mxu1 }
 0x38f   :  { %v3623_v33 = vadd.f32 %v3622_v31, %v3570_v8  ;;  %v2704_v38 = vpop.f32.mrb[19].mxu1  ;;  %v5355_v18 = vadd.f32 %v3617_v35, %v5349_v34 }
 0x390   :  { %v5352_v22 = vadd.f32 %v3620_v53, %v5349_v34  ;;  %v3626_v1 = vadd.f32 %v3625_v10, %v2704_v38 }
 0x391   :  { %v5361_v21 = vadd.f32 %v3623_v33, %v5349_v34  ;;  %v2829_v59 = vmul.f32 %v5355_v18, %v5355_v18 }
 0x392   :  { %v5358_v39 = vadd.f32 %v3626_v1, %v5349_v34  ;;  %v2827_v25 = vmul.f32 %v5352_v22, %v5352_v22 }
 0x393   :  { %v2830_v32 = vmul.f32 %v5361_v21, %v5361_v21 }
 0x394   :  { %v2805_v0 = vadd.f32 %v5358_v39, %v5352_v22  ;;  %v2828_v31 = vmul.f32 %v5358_v39, %v5358_v39  ;;  %v3573_v5 = vpop.f32.mrb[20].mxu1 }
 0x395   :  { %v3629_v10 = vadd.f32 %v3628_v52, %v3573_v5  ;;  %v2717_v41 = vpop.f32.mrb[21].mxu1 }
 0x396   :  { %v2806_v30 = vadd.f32 %v2805_v0, %v5355_v18  ;;  %v2843_v51 = vadd.f32 %v2828_v31, %v2827_v25  ;;  %v3632_v37 = vadd.f32 %v5317_v45, %v2717_v41  ;;  %v3574_v63 = vpop.f32.mrb[22].mxu1 }
 0x397   :  { %v3635_v58 = vadd.f32 %v3634_v56, %v3574_v63  ;;  %v2720_v54 = vpop.f32.mrb[23].mxu1  ;;  %v5381_v20 = vadd.f32 %v3629_v10, %v5349_v34 }
 0x398   :  { %v2844_v44 = vadd.f32 %v2843_v51, %v2829_v59  ;;  %v5376_v60 = vadd.f32 %v3632_v37, %v5349_v34  ;;  %v2807_v52 = vadd.f32 %v2806_v30, %v5361_v21  ;;  %v3638_v11 = vadd.f32 %v5320_v36, %v2720_v54 }
 0x399   :  { %v5390_v46 = vadd.f32 %v3635_v58, %v5349_v34  ;;  %v2833_v3 = vmul.f32 %v5381_v20, %v5381_v20 }
 0x39a   :  { %v2808_v29 = vadd.f32 %v2807_v52, %v5376_v60  ;;  %v2831_v45 = vmul.f32 %v5376_v60, %v5376_v60  ;;  %v2845_v17 = vadd.f32 %v2844_v44, %v2830_v32  ;;  %v5387_v56 = vadd.f32 %v3638_v11, %v5349_v34 }
 0x39b   :  { %v2834_v43 = vmul.f32 %v5390_v46, %v5390_v46 }
 0x39c   :  { %v2846_v2 = vadd.f32 %v2845_v17, %v2831_v45  ;;  %v2809_v4 = vadd.f32 %v2808_v29, %v5387_v56  ;;  %v2832_v36 = vmul.f32 %v5387_v56, %v5387_v56  ;;  %v3577_v47 = vpop.f32.mrb[24].mxu1 }
 0x39d   :  { %v3641_v7 = vadd.f32 %v3640_v61, %v3577_v47  ;;  %v2733_v55 = vpop.f32.mrb[25].mxu1 }
 0x39e   :  { %v2810_v57 = vadd.f32 %v2809_v4, %v5381_v20  ;;  %v2847_v12 = vadd.f32 %v2846_v2, %v2832_v36  ;;  %v3644_v48 = vadd.f32 %v5325_v16, %v2733_v55  ;;  %v3578_v13 = vpop.f32.mrb[26].mxu1 }
 0x39f   :  { %v3647_v15 = vadd.f32 %v5332_v40, %v3578_v13  ;;  %v2736_v23 = vpop.f32.mrb[27].mxu1  ;;  %v5408_v26 = vadd.f32 %v3641_v7, %v5349_v34 }
 0x3a0   :  { %v2848_v19 = vadd.f32 %v2847_v12, %v2833_v3  ;;  %v5403_v24 = vadd.f32 %v3644_v48, %v5349_v34  ;;  %v2811_v61 = vadd.f32 %v2810_v57, %v5390_v46  ;;  %v3650_v42 = vadd.f32 %v5328_v28, %v2736_v23 }
 0x3a1   :  { %v5417_v9 = vadd.f32 %v3647_v15, %v5349_v34  ;;  %v2837_v25 = vmul.f32 %v5408_v26, %v5408_v26 }
 0x3a2   :  { %v2812_v16 = vadd.f32 %v2811_v61, %v5403_v24  ;;  %v2835_v50 = vmul.f32 %v5403_v24, %v5403_v24  ;;  %v2849_v35 = vadd.f32 %v2848_v19, %v2834_v43  ;;  %v5414_v40 = vadd.f32 %v3650_v42, %v5349_v34 }
 0x3a3   :  { %v2838_v41 = vmul.f32 %v5417_v9, %v5417_v9 }
 0x3a4   :  { %v2850_v53 = vadd.f32 %v2849_v35, %v2835_v50  ;;  %v2813_v8 = vadd.f32 %v2812_v16, %v5414_v40  ;;  %v2836_v28 = vmul.f32 %v5414_v40, %v5414_v40  ;;  %v3581_v33 = vpop.f32.mrb[28].mxu1 }
 0x3a5   :  { %v3653_v38 = vadd.f32 %v5341_v49, %v3581_v33  ;;  %v2749_v1 = vpop.f32.mrb[29].mxu1 }
 0x3a6   :  { %v2814_v0 = vadd.f32 %v2813_v8, %v5408_v26  ;;  %v2851_v31 = vadd.f32 %v2850_v53, %v2836_v28  ;;  %v3656_v5 = vadd.f32 %v5335_v27, %v2749_v1  ;;  %v3582_v10 = vpop.f32.mrb[30].mxu1  ;;  %v2803_v8 = vld [vmem:[%s5476_s7] sm:$0x1]  ;;  %s4082_s7 = smov [#allocation4]  }
 0x3a7   :  { %v3659_v59 = vadd.f32 %v5344_v6, %v3582_v10  ;;  %v2752_v30 = vpop.f32.mrb[31].mxu1  ;;  %v2801_v32 = vadd.f32 %v3653_v38, %v5349_v34  ;;  %v2804_v38 = vld [vmem:[%s5477_s8] sm:$0x1]  ;;  %s2954_s8 = sshll.u32 %s4082_s7, 4  ;;  %s2955_s8 = int_to_ptr.vmem [resolvable:$true] %s2954_s8 }
 0x3a8   :  { %v2852_v51 = vadd.f32 %v2851_v31, %v2837_v25  ;;  %v2799_v37 = vadd.f32 %v3656_v5, %v5349_v34  ;;  %v2815_v49 = vadd.f32 %v2814_v0, %v5417_v9  ;;  %v3662_v63 = vadd.f32 %v5338_v14, %v2752_v30  ;;  %s4055_s12 = scalar_lea.vmem %s2955_s8, 2048  ;;  %p4060_p1 = scmp.lt.s32.totalorder %s2955_s8, %s2955_s8 }
 0x3a9   :  { %v2802_v11 = vadd.f32 %v3659_v59, %v5349_v34  ;;  %v2841_v45 = vmul.f32 %v2801_v32, %v2801_v32  ;;  %p4056_p0 = scmp.ne.s32.totalorder %s2955_s8, %s4055_s12  ;;  %p4061_p2 = scmp.lt.s32.totalorder %s4055_s12, %s4055_s12 }
 0x3aa   :  { %v2816_v58 = vadd.f32 %v2815_v49, %v2799_v37  ;;  %v2839_v54 = vmul.f32 %v2799_v37, %v2799_v37  ;;  %v2853_v44 = vadd.f32 %v2852_v51, %v2838_v41  ;;  %v2800_v27 = vadd.f32 %v3662_v63, %v5349_v34 }
 0x3ab   :  { %v2842_v4 = vmul.f32 %v2802_v11, %v2802_v11  ;;  %p4062_p3 = por %p4061_p2, %p4060_p1 }
 0x3ac   :  { %v2854_v52 = vadd.f32 %v2853_v44, %v2839_v54  ;;  %v2817_v29 = vadd.f32 %v2816_v58, %v2800_v27  ;;  %v2840_v6 = vmul.f32 %v2800_v27, %v2800_v27 }
 0x3ad   :  { %p4063_p4 = pnand %p4062_p3, %p4056_p0 }
 0x3ae   :  { %v2818_v17 = vadd.f32 %v2817_v29, %v2801_v32  ;;  %v2855_v2 = vadd.f32 %v2854_v52, %v2840_v6 }
 0x3b0   :  { %v2819_v36 = vadd.f32 %v2818_v17, %v2802_v11  ;;  %v2856_v47 = vadd.f32 %v2855_v2, %v2841_v45 }
 0x3b2   :  { %v2820_v7 = vrot.slane %v2819_v36, 4  ;;  %v2857_v14 = vadd.f32 %v2856_v47, %v2842_v4 }
 0x3b4   :  { %v2821_v55 = vadd.f32 %v2820_v7, %v2819_v36  ;;  %v2858_v3 = vrot.slane %v2857_v14, 4 }
 0x3b6   :  { %v2822_v57 = vrot.slane %v2821_v55, 2  ;;  %v2859_v12 = vadd.f32 %v2858_v3, %v2857_v14 }
 0x3b8   :  { %v2823_v48 = vadd.f32 %v2822_v57, %v2821_v55  ;;  %v2860_v13 = vrot.slane %v2859_v12, 2 }
 0x3ba   :  { %v2824_v43 = vrot.slane %v2823_v48, 1  ;;  %v2861_v15 = vadd.f32 %v2860_v13, %v2859_v12 }
 0x3bc   :  { %v2825_v23 = vadd.f32 %v2824_v43, %v2823_v48  ;;  %v2862_v34 = vrot.slane %v2861_v15, 1 }
 0x3be   :  { %v2826_v19 = vmul.f32 0.0078125, %v2825_v23  ;;  %v2863_v61 = vadd.f32 %v2862_v34, %v2861_v15 }
 0x3c0   :  { %v2864_v42 = vmul.f32 0.0078125, %v2863_v61  ;;  %v2865_v16 = vmul.f32 %v2826_v19, %v2826_v19 }
 0x3c2   :  { %v2866_v50 = vsub.f32 %v2864_v42, %v2865_v16 }
 0x3c4   :  { %v2867_v35 = vmax.f32 %v2866_v50, 0.0 }
 0x3c6   :  { %v2868_v53 = vadd.f32 1e-05, %v2867_v35 }
 0x3c8   :  { %4052 = vrsqrt.f32 %v2868_v53 }
 0x3d2   :  { %v4053_v28 = vpop.eup %4052 }
 0x3d3   :  { %v2870_v33 = vmul.f32 %v4053_v28, %v2803_v8 }
 0x3d5   :  { %v2871_v1 = vmul.f32 %v2870_v33, %v2826_v19  ;;  %v2877_v25 = vrot.slane %v2870_v33, %v4790_v62 }
 0x3d7   :  { %v2872_v0 = vsub.f32 %v2804_v38, %v2871_v1  ;;  %v2892_v31 = vmul.f32 %v2877_v25, %v2800_v27  ;;  %v2879_v5 = vmul.f32 %v2877_v25, %v5352_v22  ;;  %v2880_v10 = vmul.f32 %v2877_v25, %v5358_v39 }
 0x3d8   :  { %v2881_v41 = vmul.f32 %v2877_v25, %v5355_v18  ;;  %v2882_v59 = vmul.f32 %v2877_v25, %v5361_v21  ;;  %v2883_v30 = vmul.f32 %v2877_v25, %v5376_v60  ;;  %v2884_v51 = vmul.f32 %v2877_v25, %v5387_v56 }
 0x3d9   :  { %v2899_v49 = vrot.slane %v2872_v0, %v4790_v62  ;;  %v2885_v63 = vmul.f32 %v2877_v25, %v5381_v20  ;;  %v2886_v58 = vmul.f32 %v2877_v25, %v5390_v46  ;;  %v2887_v54 = vmul.f32 %v2877_v25, %v5403_v24 }
 0x3da   :  { %v2888_v22 = vmul.f32 %v2877_v25, %v5414_v40  ;;  %v2889_v39 = vmul.f32 %v2877_v25, %v5408_v26  ;;  %v2890_v18 = vmul.f32 %v2877_v25, %v5417_v9  ;;  %v2891_v44 = vmul.f32 %v2877_v25, %v2799_v37 }
 0x3db   :  { %v2914_v21 = vadd.f32 %v2899_v49, %v2892_v31  ;;  %v2893_v27 = vmul.f32 %v2877_v25, %v2801_v32  ;;  %v2894_v60 = vmul.f32 %v2877_v25, %v2802_v11  ;;  %v2901_v52 = vadd.f32 %v2899_v49, %v2879_v5 }
 0x3dc   :  { %v2902_v56 = vadd.f32 %v2899_v49, %v2880_v10  ;;  %v2903_v29 = vadd.f32 %v2899_v49, %v2881_v41  ;;  %v2904_v62 = vadd.f32 %v2899_v49, %v2882_v59  ;;  %v2905_v6 = vadd.f32 %v2899_v49, %v2883_v30 }
 0x3dd   :  { %v2930_v20 = vmax.f32 %v2914_v21, 0.0  ;;  %v2906_v45 = vadd.f32 %v2899_v49, %v2884_v51  ;;  %v2907_v46 = vadd.f32 %v2899_v49, %v2885_v63  ;;  %v2908_v17 = vadd.f32 %v2899_v49, %v2886_v58 }
 0x3de   :  { %v2909_v24 = vadd.f32 %v2899_v49, %v2887_v54  ;;  %v2910_v2 = vadd.f32 %v2899_v49, %v2888_v22  ;;  %v2911_v40 = vadd.f32 %v2899_v49, %v2889_v39  ;;  %v2912_v4 = vadd.f32 %v2899_v49, %v2890_v18 }
 0x3df   :  { %2946 = vst [vmem:[#allocation4 + $0x68] sm:$0xff] %v2930_v20  ;;  %v2913_v26 = vadd.f32 %v2899_v49, %v2891_v44  ;;  %v2915_v9 = vadd.f32 %v2899_v49, %v2893_v27  ;;  %v2916_v37 = vadd.f32 %v2899_v49, %v2894_v60  ;;  %v2917_v36 = vmax.f32 %v2901_v52, 0.0 }
 0x3e0   :  { %v2918_v32 = vmax.f32 %v2902_v56, 0.0  ;;  %v2919_v11 = vmax.f32 %v2903_v29, 0.0  ;;  %v2920_v47 = vmax.f32 %v2904_v62, 0.0  ;;  %v2921_v7 = vmax.f32 %v2905_v6, 0.0 }
 0x3e1   :  { %v2922_v14 = vmax.f32 %v2906_v45, 0.0  ;;  %v2923_v55 = vmax.f32 %v2907_v46, 0.0  ;;  %v2924_v3 = vmax.f32 %v2908_v17, 0.0  ;;  %v2925_v57 = vmax.f32 %v2909_v24, 0.0  ;;  %2933 = vst [vmem:[#allocation4] sm:$0xff] %v2917_v36 }
 0x3e2   :  { %v2926_v12 = vmax.f32 %v2910_v2, 0.0  ;;  %v2927_v48 = vmax.f32 %v2911_v40, 0.0  ;;  %v2928_v13 = vmax.f32 %v2912_v4, 0.0  ;;  %v2929_v43 = vmax.f32 %v2913_v26, 0.0  ;;  %2934 = vst [vmem:[#allocation4 + $0x8] sm:$0xff] %v2918_v32  ;;  %2935 = vst [vmem:[#allocation4 + $0x10] sm:$0xff] %v2919_v11 }
 0x3e3   :  { %2936 = vst [vmem:[#allocation4 + $0x18] sm:$0xff] %v2920_v47  ;;  %2937 = vst [vmem:[#allocation4 + $0x20] sm:$0xff] %v2921_v7  ;;  %v2931_v15 = vmax.f32 %v2915_v9, 0.0  ;;  %v2932_v23 = vmax.f32 %v2916_v37, 0.0 }
 0x3e4   :  { %2938 = vst [vmem:[#allocation4 + $0x28] sm:$0xff] %v2922_v14  ;;  %2939 = vst [vmem:[#allocation4 + $0x30] sm:$0xff] %v2923_v55 }
 0x3e5   :  { %2940 = vst [vmem:[#allocation4 + $0x38] sm:$0xff] %v2924_v3  ;;  %2941 = vst [vmem:[#allocation4 + $0x40] sm:$0xff] %v2925_v57 }
 0x3e6   :  { %2942 = vst [vmem:[#allocation4 + $0x48] sm:$0xff] %v2926_v12  ;;  %2943 = vst [vmem:[#allocation4 + $0x50] sm:$0xff] %v2927_v48 }
 0x3e7   :  { %2944 = vst [vmem:[#allocation4 + $0x58] sm:$0xff] %v2928_v13  ;;  %2945 = vst [vmem:[#allocation4 + $0x60] sm:$0xff] %v2929_v43 }
 0x3e8   :  { %2947 = vst [vmem:[#allocation4 + $0x70] sm:$0xff] %v2931_v15  ;;  %2948 = vst [vmem:[#allocation4 + $0x78] sm:$0xff] %v2932_v23 }
 0x3e9   :  { %4066 = shalt.err (!%p4063_p4)
}
 0x3ea   :  { %s4067_s15 = scalar_lea.hbm %s5478_s9, 2048 }
 0x3eb   :  { %p4068_p5 = scmp.ne.s32.totalorder %s5478_s9, %s4067_s15  ;;  %p4071_p6 = scmp.lt.u32.totalorder %s4067_s15, %s5478_s9 }
 0x3ed   :  { %p4073_p7 = pnand %p4071_p6, %p4068_p5 }
 0x3ef   :  { %4076 = shalt.err (!%p4073_p7)
}
 0x3f0   :  { %s4083_s20 = smov 128  }
 0x3f1   :  { %2960 = dma.vmem_to_hbm [thread:$0]  %s2955_s8, 2048, %s5478_s9, [#allocation5], %s4083_s20, %s4083_s20, %s4080_s0  }
 0x3f2   :  { %4077 = dma.done.wait [#allocation5], 2048  }
 0x3f3   :  { %4078 = vsyncadd [#allocation5], 4294965248 }
 0x3f4   :  { %2964 = vsyncpa [#allocation5], 1 }

</bundles_post_ra>
